<compile_context>
chip_gen: v6e
topology: v6e:2x2x1
jax: 0.10.0
libtpu: 0.0.40
codegen_flags: <defaults>
</compile_context>

<pallas_src>
import functools
import math

import jax
import jax.numpy as jnp
from jax import lax
from jax.experimental import pallas as pl
from jax.experimental.pallas import tpu as pltpu


def _gru_seq_kernel(
    x_ref, h0_ref,
    wx_ref, bx_ref, wh_ref, whh_ref, wy_ref, by_ref,
    y_ref, hfin_ref,
    xproj_ref,
    *, seq_len, h_size,
):
    H = h_size
    T = seq_len
    T_lanes = y_ref.shape[1]

    # Hoisted x-side projection for ALL timesteps: one wide MXU matmul
    # (T, D) @ (D, 3H), stored to VMEM scratch and sliced per step.
    xproj_ref[...] = (
        jnp.dot(x_ref[...], wx_ref[...], preferred_element_type=jnp.float32)
        + bx_ref[...]
    )

    # Weights held as values across the (unrolled) recurrence.
    wh = wh_ref[...]
    whh = whh_ref[...]
    wy = wy_ref[...]
    by = by_ref[...]

    lane_ids = lax.broadcasted_iota(jnp.int32, (1, T_lanes), 1)

    def step(t, carry):
        h, y_acc = carry                                  # (1, H), (1, T_lanes)
        xp = xproj_ref[pl.ds(t, 1), :]                    # (1, 3H)
        hp = jnp.dot(h, wh, preferred_element_type=jnp.float32)   # (1, 2H)

        zr = jax.nn.sigmoid(xp[:, 0:2 * H] + hp)          # one EUP pass for z and r
        z = zr[:, 0:H]
        r = zr[:, H:2 * H]

        h_tilde = jnp.tanh(
            xp[:, 2 * H:3 * H]
            + jnp.dot(r * h, whh, preferred_element_type=jnp.float32)
        )
        h_new = z * h + (1.0 - z) * h_tilde               # (1, H)

        y_t = jnp.dot(h_new, wy, preferred_element_type=jnp.float32) + by  # (1, 1)
        onehot = (lane_ids == t).astype(jnp.float32)      # (1, T_lanes)
        y_acc = y_acc + onehot * y_t                      # lane-broadcast of y_t

        return h_new, y_acc

    h0 = h0_ref[...]
    y0 = jnp.zeros((1, T_lanes), jnp.float32)
    unroll = True if T <= 32 else 8
    h_fin, y_all = lax.fori_loop(0, T, step, (h0, y0), unroll=unroll)

    # Single lane-dense store of all per-step predictions + one hidden write.
    y_ref[...] = y_all
    hfin_ref[...] = h_fin


def gru_regressor_sequence(xs, h0, params):
    """Run T GRU steps in one kernel.

    xs: (T, D) sequence of inputs, h0: (1, H) initial hidden state.
    Returns (y: (T,), h_final: (1, H)).
    """
    wx, bx, wh, whh, wy, by = params
    T, D = xs.shape
    H = h0.shape[1]
    T_lanes = ((T + 127) // 128) * 128  # lane-dense y output row

    kernel = functools.partial(_gru_seq_kernel, seq_len=T, h_size=H)

    def vmem():
        return pl.BlockSpec(memory_space=pltpu.MemorySpace.VMEM)

    flops = 2 * T * (D * 3 * H + H * 2 * H + H * H + H)
    transcendentals = T * 3 * H
    bytes_accessed = (
        sum(int(a.size) * 4 for a in (xs, h0, wx, bx, wh, whh, wy, by))
        + (T_lanes + H) * 4
    )

    y_pad, h_fin = pl.pallas_call(
        kernel,
        out_shape=(
            jax.ShapeDtypeStruct((1, T_lanes), jnp.float32),
            jax.ShapeDtypeStruct((1, H), jnp.float32),
        ),
        in_specs=[vmem() for _ in range(8)],
        out_specs=(vmem(), vmem()),
        scratch_shapes=[pltpu.VMEM((T, 3 * H), jnp.float32)],
        cost_estimate=pl.CostEstimate(
            flops=flops,
            transcendentals=transcendentals,
            bytes_accessed=bytes_accessed,
        ),
        compiler_params=pltpu.CompilerParams(vmem_limit_bytes=16 * 1024 * 1024),
    )(xs, h0, wx, bx, wh, whh, wy, by)

    return y_pad[0, :T], h_fin


def init_params(key, input_size, h_size, out_size=1):
    """PyTorch-style uniform(-1/sqrt(fan_in), 1/sqrt(fan_in)) init, with the
    per-gate Linear weights built individually and then concatenated into the
    fused layout the kernel consumes."""
    keys = jax.random.split(key, 11)

    def lin_w(k, fan_in, fan_out):
        bound = 1.0 / math.sqrt(fan_in)
        return jax.random.uniform(k, (fan_in, fan_out), jnp.float32, -bound, bound)

    def lin_b(k, fan_in, fan_out):
        bound = 1.0 / math.sqrt(fan_in)
        return jax.random.uniform(k, (1, fan_out), jnp.float32, -bound, bound)

    wxz = lin_w(keys[0], input_size, h_size)
    bxz = lin_b(keys[1], input_size, h_size)
    wxr = lin_w(keys[2], input_size, h_size)
    bxr = lin_b(keys[3], input_size, h_size)
    wxh = lin_w(keys[4], input_size, h_size)
    bxh = lin_b(keys[5], input_size, h_size)
    whz = lin_w(keys[6], h_size, h_size)   # bias=False
    whr = lin_w(keys[7], h_size, h_size)   # bias=False
    whh = lin_w(keys[8], h_size, h_size)   # bias=False
    wy = lin_w(keys[9], h_size, out_size)
    by = lin_b(keys[10], h_size, out_size)

    wx = jnp.concatenate([wxz, wxr, wxh], axis=1)   # (D, 3H)
    bx = jnp.concatenate([bxz, bxr, bxh], axis=1)   # (1, 3H)
    wh = jnp.concatenate([whz, whr], axis=1)        # (H, 2H)
    return (wx, bx, wh, whh, wy, by)


def reference_sequence(xs, h0, params):
    """Plain-JAX re-statement of the module's forward, looped over time."""
    wx, bx, wh, whh, wy, by = params
    H = whh.shape[0]
    h = h0
    ys = []
    for t in range(xs.shape[0]):
        x = xs[t:t + 1]
        xp = x @ wx + bx
        hp = h @ wh
        z = jax.nn.sigmoid(xp[:, 0:H] + hp[:, 0:H])
        r = jax.nn.sigmoid(xp[:, H:2 * H] + hp[:, H:2 * H])
        h = z * h + (1.0 - z) * jnp.tanh(xp[:, 2 * H:3 * H] + (r * h) @ whh)
        ys.append((h @ wy + by).reshape(1))
    return jnp.concatenate(ys), h


if __name__ == "__main__":
    input_size = 8
    h_size = 32
    seq_len = 8

    key = jax.random.PRNGKey(0)
    k_param, k_x = jax.random.split(key)

    params = init_params(k_param, input_size, h_size)
    xs = jax.random.normal(k_x, (seq_len, input_size), jnp.float32)
    h0 = jnp.zeros((1, h_size), jnp.float32)   # self.hidden = torch.zeros(h_size)

    # Full fused sequence from the zero hidden state.
    y_seq, h_fin = gru_regressor_sequence(xs, h0, params)
    jax.block_until_ready((y_seq, h_fin))

    # Plain-JAX reference.
    ry, rh = reference_sequence(xs, h0, params)
    assert jnp.allclose(y_seq, ry, atol=1e-4, rtol=1e-4), (y_seq, ry)
    assert jnp.allclose(h_fin, rh, atol=1e-4, rtol=1e-4)

    # Carried-hidden path: run the same sequence in two chunks, carrying h
    # across kernel calls (matches the module carrying self.hidden).
    y_a, h_a = gru_regressor_sequence(xs[:4], h0, params)
    y_b, h_b = gru_regressor_sequence(xs[4:], h_a, params)
    jax.block_until_ready((y_b, h_b))
    assert jnp.allclose(jnp.concatenate([y_a, y_b]), ry, atol=1e-4, rtol=1e-4)
    assert jnp.allclose(h_b, rh, atol=1e-4, rtol=1e-4)

    # TODO(synk): the module's train() loop (DataLoader shuffling, Adam, MSE
    # backward) is host-side training logic, not part of the forward kernel.

    print("KERNEL_OK")
</pallas_src>

<mosaic_0001>
module attributes {stable_mosaic.version = 11 : i64} {
  func.func @_gru_seq_kernel(%arg0: memref<8x8xf32, #tpu.memory_space<vmem>>, %arg1: memref<1x32xf32, #tpu.memory_space<vmem>>, %arg2: memref<8x96xf32, #tpu.memory_space<vmem>>, %arg3: memref<1x96xf32, #tpu.memory_space<vmem>>, %arg4: memref<32x64xf32, #tpu.memory_space<vmem>>, %arg5: memref<32x32xf32, #tpu.memory_space<vmem>>, %arg6: memref<32x1xf32, #tpu.memory_space<vmem>>, %arg7: memref<1x1xf32, #tpu.memory_space<vmem>>, %arg8: memref<1x128xf32, #tpu.memory_space<vmem>>, %arg9: memref<1x32xf32, #tpu.memory_space<vmem>>, %arg10: memref<8x96xf32, #tpu.memory_space<vmem>>) attributes {dimension_semantics = [], scalar_prefetch = 0 : i64, scratch_operands = 1 : i64, tpu.core_type = #tpu.core_type<tc>} {
    %c0 = arith.constant 0 : index
    %c0_0 = arith.constant 0 : index
    %0 = vector.load %arg0[%c0, %c0_0] : memref<8x8xf32, #tpu.memory_space<vmem>>, vector<8x8xf32>
    %c0_1 = arith.constant 0 : index
    %c0_2 = arith.constant 0 : index
    %1 = vector.load %arg2[%c0_1, %c0_2] : memref<8x96xf32, #tpu.memory_space<vmem>>, vector<8x96xf32>
    %cst = arith.constant dense<0.000000e+00> : vector<8x96xf32>
    %2 = tpu.matmul %0, %1, %cst {dimension_numbers = #tpu.dot_dimension_numbers<[1], [0], [0], [1], [0, 0, 1, 1], [], []>} : vector<8x8xf32>, vector<8x96xf32>, vector<8x96xf32> -> vector<8x96xf32>
    %c0_3 = arith.constant 0 : index
    %c0_4 = arith.constant 0 : index
    %3 = vector.load %arg3[%c0_3, %c0_4] : memref<1x96xf32, #tpu.memory_space<vmem>>, vector<1x96xf32>
    %4 = vector.broadcast %3 : vector<1x96xf32> to vector<8x96xf32>
    %5 = arith.addf %2, %4 : vector<8x96xf32>
    %c0_5 = arith.constant 0 : index
    %c0_6 = arith.constant 0 : index
    %6 = vector.load %arg10[%c0_5, %c0_6] : memref<8x96xf32, #tpu.memory_space<vmem>>, vector<8x96xf32>
    tpu.vector_store %arg10[%c0_5, %c0_6], %5 {strides = array<i32>} : memref<8x96xf32, #tpu.memory_space<vmem>>, vector<8x96xf32>,
    %c0_7 = arith.constant 0 : index
    %c0_8 = arith.constant 0 : index
    %7 = vector.load %arg4[%c0_7, %c0_8] : memref<32x64xf32, #tpu.memory_space<vmem>>, vector<32x64xf32>
    %c0_9 = arith.constant 0 : index
    %c0_10 = arith.constant 0 : index
    %8 = vector.load %arg5[%c0_9, %c0_10] : memref<32x32xf32, #tpu.memory_space<vmem>>, vector<32x32xf32>
    %c0_11 = arith.constant 0 : index
    %c0_12 = arith.constant 0 : index
    %9 = vector.load %arg6[%c0_11, %c0_12] : memref<32x1xf32, #tpu.memory_space<vmem>>, vector<32x1xf32>
    %c0_13 = arith.constant 0 : index
    %c0_14 = arith.constant 0 : index
    %10 = vector.load %arg7[%c0_13, %c0_14] : memref<1x1xf32, #tpu.memory_space<vmem>>, vector<1x1xf32>
    %11 = tpu.iota {dimensions = array<i32: 1>} : vector<1x128xi32>
    %c0_15 = arith.constant 0 : index
    %c0_16 = arith.constant 0 : index
    %12 = vector.load %arg1[%c0_15, %c0_16] : memref<1x32xf32, #tpu.memory_space<vmem>>, vector<1x32xf32>
    %cst_17 = arith.constant 0.000000e+00 : f32
    %13 = vector.broadcast %cst_17 : f32 to vector<1x128xf32>
    %c0_i32 = arith.constant 0 : i32
    %14 = arith.index_cast %c0_i32 : i32 to index
    %c0_18 = arith.constant 0 : index
    %15 = vector.load %arg10[%14, %c0_18] : memref<8x96xf32, #tpu.memory_space<vmem>>, vector<1x96xf32>
    %cst_19 = arith.constant dense<0.000000e+00> : vector<1x64xf32>
    %16 = tpu.matmul %12, %7, %cst_19 {dimension_numbers = #tpu.dot_dimension_numbers<[1], [0], [0], [1], [0, 0, 1, 1], [], []>} : vector<1x32xf32>, vector<32x64xf32>, vector<1x64xf32> -> vector<1x64xf32>
    %17 = vector.extract_strided_slice %15 {offsets = [0, 0], sizes = [1, 64], strides = [1, 1]} : vector<1x96xf32> to vector<1x64xf32>
    %18 = arith.addf %17, %16 : vector<1x64xf32>
    %19 = arith.negf %18 : vector<1x64xf32>
    %20 = math.exp %19 : vector<1x64xf32>
    %cst_20 = arith.constant 1.000000e+00 : f32
    %21 = vector.broadcast %cst_20 : f32 to vector<1x64xf32>
    %22 = arith.addf %21, %20 : vector<1x64xf32>
    %23 = arith.divf %21, %22 : vector<1x64xf32>
    %24 = vector.extract_strided_slice %23 {offsets = [0, 0], sizes = [1, 32], strides = [1, 1]} : vector<1x64xf32> to vector<1x32xf32>
    %25 = vector.extract_strided_slice %23 {offsets = [0, 32], sizes = [1, 32], strides = [1, 1]} : vector<1x64xf32> to vector<1x32xf32>
    %26 = vector.extract_strided_slice %15 {offsets = [0, 64], sizes = [1, 32], strides = [1, 1]} : vector<1x96xf32> to vector<1x32xf32>
    %27 = arith.mulf %25, %12 : vector<1x32xf32>
    %cst_21 = arith.constant dense<0.000000e+00> : vector<1x32xf32>
    %28 = tpu.matmul %27, %8, %cst_21 {dimension_numbers = #tpu.dot_dimension_numbers<[1], [0], [0], [1], [0, 0, 1, 1], [], []>} : vector<1x32xf32>, vector<32x32xf32>, vector<1x32xf32> -> vector<1x32xf32>
    %29 = arith.addf %26, %28 : vector<1x32xf32>
    %30 = math.tanh %29 : vector<1x32xf32>
    %31 = arith.mulf %24, %12 : vector<1x32xf32>
    %cst_22 = arith.constant 1.000000e+00 : f32
    %32 = vector.broadcast %cst_22 : f32 to vector<1x32xf32>
    %33 = arith.subf %32, %24 : vector<1x32xf32>
    %34 = arith.mulf %33, %30 : vector<1x32xf32>
    %35 = arith.addf %31, %34 : vector<1x32xf32>
    %cst_23 = arith.constant dense<0.000000e+00> : vector<1x1xf32>
    %36 = tpu.matmul %35, %9, %cst_23 {dimension_numbers = #tpu.dot_dimension_numbers<[1], [0], [0], [1], [0, 0, 1, 1], [], []>} : vector<1x32xf32>, vector<32x1xf32>, vector<1x1xf32> -> vector<1x1xf32>
    %37 = arith.addf %36, %10 : vector<1x1xf32>
    %38 = vector.broadcast %c0_i32 : i32 to vector<1x128xi32>
    %39 = arith.cmpi eq, %11, %38 : vector<1x128xi32>
    %40 = arith.extui %39 : vector<1x128xi1> to vector<1x128xi32>
    %41 = arith.sitofp %40 : vector<1x128xi32> to vector<1x128xf32>
    %42 = vector.broadcast %37 : vector<1x1xf32> to vector<1x128xf32>
    %43 = arith.mulf %41, %42 : vector<1x128xf32>
    %44 = arith.addf %13, %43 : vector<1x128xf32>
    %c1_i32 = arith.constant 1 : i32
    %45 = arith.index_cast %c1_i32 : i32 to index
    %c0_24 = arith.constant 0 : index
    %46 = vector.load %arg10[%45, %c0_24] : memref<8x96xf32, #tpu.memory_space<vmem>>, vector<1x96xf32>
    %cst_25 = arith.constant dense<0.000000e+00> : vector<1x64xf32>
    %47 = tpu.matmul %35, %7, %cst_25 {dimension_numbers = #tpu.dot_dimension_numbers<[1], [0], [0], [1], [0, 0, 1, 1], [], []>} : vector<1x32xf32>, vector<32x64xf32>, vector<1x64xf32> -> vector<1x64xf32>
    %48 = vector.extract_strided_slice %46 {offsets = [0, 0], sizes = [1, 64], strides = [1, 1]} : vector<1x96xf32> to vector<1x64xf32>
    %49 = arith.addf %48, %47 : vector<1x64xf32>
    %50 = arith.negf %49 : vector<1x64xf32>
    %51 = math.exp %50 : vector<1x64xf32>
    %cst_26 = arith.constant 1.000000e+00 : f32
    %52 = vector.broadcast %cst_26 : f32 to vector<1x64xf32>
    %53 = arith.addf %52, %51 : vector<1x64xf32>
    %54 = arith.divf %52, %53 : vector<1x64xf32>
    %55 = vector.extract_strided_slice %54 {offsets = [0, 0], sizes = [1, 32], strides = [1, 1]} : vector<1x64xf32> to vector<1x32xf32>
    %56 = vector.extract_strided_slice %54 {offsets = [0, 32], sizes = [1, 32], strides = [1, 1]} : vector<1x64xf32> to vector<1x32xf32>
    %57 = vector.extract_strided_slice %46 {offsets = [0, 64], sizes = [1, 32], strides = [1, 1]} : vector<1x96xf32> to vector<1x32xf32>
    %58 = arith.mulf %56, %35 : vector<1x32xf32>
    %cst_27 = arith.constant dense<0.000000e+00> : vector<1x32xf32>
    %59 = tpu.matmul %58, %8, %cst_27 {dimension_numbers = #tpu.dot_dimension_numbers<[1], [0], [0], [1], [0, 0, 1, 1], [], []>} : vector<1x32xf32>, vector<32x32xf32>, vector<1x32xf32> -> vector<1x32xf32>
    %60 = arith.addf %57, %59 : vector<1x32xf32>
    %61 = math.tanh %60 : vector<1x32xf32>
    %62 = arith.mulf %55, %35 : vector<1x32xf32>
    %cst_28 = arith.constant 1.000000e+00 : f32
    %63 = vector.broadcast %cst_28 : f32 to vector<1x32xf32>
    %64 = arith.subf %63, %55 : vector<1x32xf32>
    %65 = arith.mulf %64, %61 : vector<1x32xf32>
    %66 = arith.addf %62, %65 : vector<1x32xf32>
    %cst_29 = arith.constant dense<0.000000e+00> : vector<1x1xf32>
    %67 = tpu.matmul %66, %9, %cst_29 {dimension_numbers = #tpu.dot_dimension_numbers<[1], [0], [0], [1], [0, 0, 1, 1], [], []>} : vector<1x32xf32>, vector<32x1xf32>, vector<1x1xf32> -> vector<1x1xf32>
    %68 = arith.addf %67, %10 : vector<1x1xf32>
    %69 = vector.broadcast %c1_i32 : i32 to vector<1x128xi32>
    %70 = arith.cmpi eq, %11, %69 : vector<1x128xi32>
    %71 = arith.extui %70 : vector<1x128xi1> to vector<1x128xi32>
    %72 = arith.sitofp %71 : vector<1x128xi32> to vector<1x128xf32>
    %73 = vector.broadcast %68 : vector<1x1xf32> to vector<1x128xf32>
    %74 = arith.mulf %72, %73 : vector<1x128xf32>
    %75 = arith.addf %44, %74 : vector<1x128xf32>
    %c2_i32 = arith.constant 2 : i32
    %76 = arith.index_cast %c2_i32 : i32 to index
    %c0_30 = arith.constant 0 : index
    %77 = vector.load %arg10[%76, %c0_30] : memref<8x96xf32, #tpu.memory_space<vmem>>, vector<1x96xf32>
    %cst_31 = arith.constant dense<0.000000e+00> : vector<1x64xf32>
    %78 = tpu.matmul %66, %7, %cst_31 {dimension_numbers = #tpu.dot_dimension_numbers<[1], [0], [0], [1], [0, 0, 1, 1], [], []>} : vector<1x32xf32>, vector<32x64xf32>, vector<1x64xf32> -> vector<1x64xf32>
    %79 = vector.extract_strided_slice %77 {offsets = [0, 0], sizes = [1, 64], strides = [1, 1]} : vector<1x96xf32> to vector<1x64xf32>
    %80 = arith.addf %79, %78 : vector<1x64xf32>
    %81 = arith.negf %80 : vector<1x64xf32>
    %82 = math.exp %81 : vector<1x64xf32>
    %cst_32 = arith.constant 1.000000e+00 : f32
    %83 = vector.broadcast %cst_32 : f32 to vector<1x64xf32>
    %84 = arith.addf %83, %82 : vector<1x64xf32>
    %85 = arith.divf %83, %84 : vector<1x64xf32>
    %86 = vector.extract_strided_slice %85 {offsets = [0, 0], sizes = [1, 32], strides = [1, 1]} : vector<1x64xf32> to vector<1x32xf32>
    %87 = vector.extract_strided_slice %85 {offsets = [0, 32], sizes = [1, 32], strides = [1, 1]} : vector<1x64xf32> to vector<1x32xf32>
    %88 = vector.extract_strided_slice %77 {offsets = [0, 64], sizes = [1, 32], strides = [1, 1]} : vector<1x96xf32> to vector<1x32xf32>
    %89 = arith.mulf %87, %66 : vector<1x32xf32>
    %cst_33 = arith.constant dense<0.000000e+00> : vector<1x32xf32>
    %90 = tpu.matmul %89, %8, %cst_33 {dimension_numbers = #tpu.dot_dimension_numbers<[1], [0], [0], [1], [0, 0, 1, 1], [], []>} : vector<1x32xf32>, vector<32x32xf32>, vector<1x32xf32> -> vector<1x32xf32>
    %91 = arith.addf %88, %90 : vector<1x32xf32>
    %92 = math.tanh %91 : vector<1x32xf32>
    %93 = arith.mulf %86, %66 : vector<1x32xf32>
    %cst_34 = arith.constant 1.000000e+00 : f32
    %94 = vector.broadcast %cst_34 : f32 to vector<1x32xf32>
    %95 = arith.subf %94, %86 : vector<1x32xf32>
    %96 = arith.mulf %95, %92 : vector<1x32xf32>
    %97 = arith.addf %93, %96 : vector<1x32xf32>
    %cst_35 = arith.constant dense<0.000000e+00> : vector<1x1xf32>
    %98 = tpu.matmul %97, %9, %cst_35 {dimension_numbers = #tpu.dot_dimension_numbers<[1], [0], [0], [1], [0, 0, 1, 1], [], []>} : vector<1x32xf32>, vector<32x1xf32>, vector<1x1xf32> -> vector<1x1xf32>
    %99 = arith.addf %98, %10 : vector<1x1xf32>
    %100 = vector.broadcast %c2_i32 : i32 to vector<1x128xi32>
    %101 = arith.cmpi eq, %11, %100 : vector<1x128xi32>
    %102 = arith.extui %101 : vector<1x128xi1> to vector<1x128xi32>
    %103 = arith.sitofp %102 : vector<1x128xi32> to vector<1x128xf32>
    %104 = vector.broadcast %99 : vector<1x1xf32> to vector<1x128xf32>
    %105 = arith.mulf %103, %104 : vector<1x128xf32>
    %106 = arith.addf %75, %105 : vector<1x128xf32>
    %c3_i32 = arith.constant 3 : i32
    %107 = arith.index_cast %c3_i32 : i32 to index
    %c0_36 = arith.constant 0 : index
    %108 = vector.load %arg10[%107, %c0_36] : memref<8x96xf32, #tpu.memory_space<vmem>>, vector<1x96xf32>
    %cst_37 = arith.constant dense<0.000000e+00> : vector<1x64xf32>
    %109 = tpu.matmul %97, %7, %cst_37 {dimension_numbers = #tpu.dot_dimension_numbers<[1], [0], [0], [1], [0, 0, 1, 1], [], []>} : vector<1x32xf32>, vector<32x64xf32>, vector<1x64xf32> -> vector<1x64xf32>
    %110 = vector.extract_strided_slice %108 {offsets = [0, 0], sizes = [1, 64], strides = [1, 1]} : vector<1x96xf32> to vector<1x64xf32>
    %111 = arith.addf %110, %109 : vector<1x64xf32>
    %112 = arith.negf %111 : vector<1x64xf32>
    %113 = math.exp %112 : vector<1x64xf32>
    %cst_38 = arith.constant 1.000000e+00 : f32
    %114 = vector.broadcast %cst_38 : f32 to vector<1x64xf32>
    %115 = arith.addf %114, %113 : vector<1x64xf32>
    %116 = arith.divf %114, %115 : vector<1x64xf32>
    %117 = vector.extract_strided_slice %116 {offsets = [0, 0], sizes = [1, 32], strides = [1, 1]} : vector<1x64xf32> to vector<1x32xf32>
    %118 = vector.extract_strided_slice %116 {offsets = [0, 32], sizes = [1, 32], strides = [1, 1]} : vector<1x64xf32> to vector<1x32xf32>
    %119 = vector.extract_strided_slice %108 {offsets = [0, 64], sizes = [1, 32], strides = [1, 1]} : vector<1x96xf32> to vector<1x32xf32>
    %120 = arith.mulf %118, %97 : vector<1x32xf32>
    %cst_39 = arith.constant dense<0.000000e+00> : vector<1x32xf32>
    %121 = tpu.matmul %120, %8, %cst_39 {dimension_numbers = #tpu.dot_dimension_numbers<[1], [0], [0], [1], [0, 0, 1, 1], [], []>} : vector<1x32xf32>, vector<32x32xf32>, vector<1x32xf32> -> vector<1x32xf32>
    %122 = arith.addf %119, %121 : vector<1x32xf32>
    %123 = math.tanh %122 : vector<1x32xf32>
    %124 = arith.mulf %117, %97 : vector<1x32xf32>
    %cst_40 = arith.constant 1.000000e+00 : f32
    %125 = vector.broadcast %cst_40 : f32 to vector<1x32xf32>
    %126 = arith.subf %125, %117 : vector<1x32xf32>
    %127 = arith.mulf %126, %123 : vector<1x32xf32>
    %128 = arith.addf %124, %127 : vector<1x32xf32>
    %cst_41 = arith.constant dense<0.000000e+00> : vector<1x1xf32>
    %129 = tpu.matmul %128, %9, %cst_41 {dimension_numbers = #tpu.dot_dimension_numbers<[1], [0], [0], [1], [0, 0, 1, 1], [], []>} : vector<1x32xf32>, vector<32x1xf32>, vector<1x1xf32> -> vector<1x1xf32>
    %130 = arith.addf %129, %10 : vector<1x1xf32>
    %131 = vector.broadcast %c3_i32 : i32 to vector<1x128xi32>
    %132 = arith.cmpi eq, %11, %131 : vector<1x128xi32>
    %133 = arith.extui %132 : vector<1x128xi1> to vector<1x128xi32>
    %134 = arith.sitofp %133 : vector<1x128xi32> to vector<1x128xf32>
    %135 = vector.broadcast %130 : vector<1x1xf32> to vector<1x128xf32>
    %136 = arith.mulf %134, %135 : vector<1x128xf32>
    %137 = arith.addf %106, %136 : vector<1x128xf32>
    %c4_i32 = arith.constant 4 : i32
    %138 = arith.index_cast %c4_i32 : i32 to index
    %c0_42 = arith.constant 0 : index
    %139 = vector.load %arg10[%138, %c0_42] : memref<8x96xf32, #tpu.memory_space<vmem>>, vector<1x96xf32>
    %cst_43 = arith.constant dense<0.000000e+00> : vector<1x64xf32>
    %140 = tpu.matmul %128, %7, %cst_43 {dimension_numbers = #tpu.dot_dimension_numbers<[1], [0], [0], [1], [0, 0, 1, 1], [], []>} : vector<1x32xf32>, vector<32x64xf32>, vector<1x64xf32> -> vector<1x64xf32>
    %141 = vector.extract_strided_slice %139 {offsets = [0, 0], sizes = [1, 64], strides = [1, 1]} : vector<1x96xf32> to vector<1x64xf32>
    %142 = arith.addf %141, %140 : vector<1x64xf32>
    %143 = arith.negf %142 : vector<1x64xf32>
    %144 = math.exp %143 : vector<1x64xf32>
    %cst_44 = arith.constant 1.000000e+00 : f32
    %145 = vector.broadcast %cst_44 : f32 to vector<1x64xf32>
    %146 = arith.addf %145, %144 : vector<1x64xf32>
    %147 = arith.divf %145, %146 : vector<1x64xf32>
    %148 = vector.extract_strided_slice %147 {offsets = [0, 0], sizes = [1, 32], strides = [1, 1]} : vector<1x64xf32> to vector<1x32xf32>
    %149 = vector.extract_strided_slice %147 {offsets = [0, 32], sizes = [1, 32], strides = [1, 1]} : vector<1x64xf32> to vector<1x32xf32>
    %150 = vector.extract_strided_slice %139 {offsets = [0, 64], sizes = [1, 32], strides = [1, 1]} : vector<1x96xf32> to vector<1x32xf32>
    %151 = arith.mulf %149, %128 : vector<1x32xf32>
    %cst_45 = arith.constant dense<0.000000e+00> : vector<1x32xf32>
    %152 = tpu.matmul %151, %8, %cst_45 {dimension_numbers = #tpu.dot_dimension_numbers<[1], [0], [0], [1], [0, 0, 1, 1], [], []>} : vector<1x32xf32>, vector<32x32xf32>, vector<1x32xf32> -> vector<1x32xf32>
    %153 = arith.addf %150, %152 : vector<1x32xf32>
    %154 = math.tanh %153 : vector<1x32xf32>
    %155 = arith.mulf %148, %128 : vector<1x32xf32>
    %cst_46 = arith.constant 1.000000e+00 : f32
    %156 = vector.broadcast %cst_46 : f32 to vector<1x32xf32>
    %157 = arith.subf %156, %148 : vector<1x32xf32>
    %158 = arith.mulf %157, %154 : vector<1x32xf32>
    %159 = arith.addf %155, %158 : vector<1x32xf32>
    %cst_47 = arith.constant dense<0.000000e+00> : vector<1x1xf32>
    %160 = tpu.matmul %159, %9, %cst_47 {dimension_numbers = #tpu.dot_dimension_numbers<[1], [0], [0], [1], [0, 0, 1, 1], [], []>} : vector<1x32xf32>, vector<32x1xf32>, vector<1x1xf32> -> vector<1x1xf32>
    %161 = arith.addf %160, %10 : vector<1x1xf32>
    %162 = vector.broadcast %c4_i32 : i32 to vector<1x128xi32>
    %163 = arith.cmpi eq, %11, %162 : vector<1x128xi32>
    %164 = arith.extui %163 : vector<1x128xi1> to vector<1x128xi32>
    %165 = arith.sitofp %164 : vector<1x128xi32> to vector<1x128xf32>
    %166 = vector.broadcast %161 : vector<1x1xf32> to vector<1x128xf32>
    %167 = arith.mulf %165, %166 : vector<1x128xf32>
    %168 = arith.addf %137, %167 : vector<1x128xf32>
    %c5_i32 = arith.constant 5 : i32
    %169 = arith.index_cast %c5_i32 : i32 to index
    %c0_48 = arith.constant 0 : index
    %170 = vector.load %arg10[%169, %c0_48] : memref<8x96xf32, #tpu.memory_space<vmem>>, vector<1x96xf32>
    %cst_49 = arith.constant dense<0.000000e+00> : vector<1x64xf32>
    %171 = tpu.matmul %159, %7, %cst_49 {dimension_numbers = #tpu.dot_dimension_numbers<[1], [0], [0], [1], [0, 0, 1, 1], [], []>} : vector<1x32xf32>, vector<32x64xf32>, vector<1x64xf32> -> vector<1x64xf32>
    %172 = vector.extract_strided_slice %170 {offsets = [0, 0], sizes = [1, 64], strides = [1, 1]} : vector<1x96xf32> to vector<1x64xf32>
    %173 = arith.addf %172, %171 : vector<1x64xf32>
    %174 = arith.negf %173 : vector<1x64xf32>
    %175 = math.exp %174 : vector<1x64xf32>
    %cst_50 = arith.constant 1.000000e+00 : f32
    %176 = vector.broadcast %cst_50 : f32 to vector<1x64xf32>
    %177 = arith.addf %176, %175 : vector<1x64xf32>
    %178 = arith.divf %176, %177 : vector<1x64xf32>
    %179 = vector.extract_strided_slice %178 {offsets = [0, 0], sizes = [1, 32], strides = [1, 1]} : vector<1x64xf32> to vector<1x32xf32>
    %180 = vector.extract_strided_slice %178 {offsets = [0, 32], sizes = [1, 32], strides = [1, 1]} : vector<1x64xf32> to vector<1x32xf32>
    %181 = vector.extract_strided_slice %170 {offsets = [0, 64], sizes = [1, 32], strides = [1, 1]} : vector<1x96xf32> to vector<1x32xf32>
    %182 = arith.mulf %180, %159 : vector<1x32xf32>
    %cst_51 = arith.constant dense<0.000000e+00> : vector<1x32xf32>
    %183 = tpu.matmul %182, %8, %cst_51 {dimension_numbers = #tpu.dot_dimension_numbers<[1], [0], [0], [1], [0, 0, 1, 1], [], []>} : vector<1x32xf32>, vector<32x32xf32>, vector<1x32xf32> -> vector<1x32xf32>
    %184 = arith.addf %181, %183 : vector<1x32xf32>
    %185 = math.tanh %184 : vector<1x32xf32>
    %186 = arith.mulf %179, %159 : vector<1x32xf32>
    %cst_52 = arith.constant 1.000000e+00 : f32
    %187 = vector.broadcast %cst_52 : f32 to vector<1x32xf32>
    %188 = arith.subf %187, %179 : vector<1x32xf32>
    %189 = arith.mulf %188, %185 : vector<1x32xf32>
    %190 = arith.addf %186, %189 : vector<1x32xf32>
    %cst_53 = arith.constant dense<0.000000e+00> : vector<1x1xf32>
    %191 = tpu.matmul %190, %9, %cst_53 {dimension_numbers = #tpu.dot_dimension_numbers<[1], [0], [0], [1], [0, 0, 1, 1], [], []>} : vector<1x32xf32>, vector<32x1xf32>, vector<1x1xf32> -> vector<1x1xf32>
    %192 = arith.addf %191, %10 : vector<1x1xf32>
    %193 = vector.broadcast %c5_i32 : i32 to vector<1x128xi32>
    %194 = arith.cmpi eq, %11, %193 : vector<1x128xi32>
    %195 = arith.extui %194 : vector<1x128xi1> to vector<1x128xi32>
    %196 = arith.sitofp %195 : vector<1x128xi32> to vector<1x128xf32>
    %197 = vector.broadcast %192 : vector<1x1xf32> to vector<1x128xf32>
    %198 = arith.mulf %196, %197 : vector<1x128xf32>
    %199 = arith.addf %168, %198 : vector<1x128xf32>
    %c6_i32 = arith.constant 6 : i32
    %200 = arith.index_cast %c6_i32 : i32 to index
    %c0_54 = arith.constant 0 : index
    %201 = vector.load %arg10[%200, %c0_54] : memref<8x96xf32, #tpu.memory_space<vmem>>, vector<1x96xf32>
    %cst_55 = arith.constant dense<0.000000e+00> : vector<1x64xf32>
    %202 = tpu.matmul %190, %7, %cst_55 {dimension_numbers = #tpu.dot_dimension_numbers<[1], [0], [0], [1], [0, 0, 1, 1], [], []>} : vector<1x32xf32>, vector<32x64xf32>, vector<1x64xf32> -> vector<1x64xf32>
    %203 = vector.extract_strided_slice %201 {offsets = [0, 0], sizes = [1, 64], strides = [1, 1]} : vector<1x96xf32> to vector<1x64xf32>
    %204 = arith.addf %203, %202 : vector<1x64xf32>
    %205 = arith.negf %204 : vector<1x64xf32>
    %206 = math.exp %205 : vector<1x64xf32>
    %cst_56 = arith.constant 1.000000e+00 : f32
    %207 = vector.broadcast %cst_56 : f32 to vector<1x64xf32>
    %208 = arith.addf %207, %206 : vector<1x64xf32>
    %209 = arith.divf %207, %208 : vector<1x64xf32>
    %210 = vector.extract_strided_slice %209 {offsets = [0, 0], sizes = [1, 32], strides = [1, 1]} : vector<1x64xf32> to vector<1x32xf32>
    %211 = vector.extract_strided_slice %209 {offsets = [0, 32], sizes = [1, 32], strides = [1, 1]} : vector<1x64xf32> to vector<1x32xf32>
    %212 = vector.extract_strided_slice %201 {offsets = [0, 64], sizes = [1, 32], strides = [1, 1]} : vector<1x96xf32> to vector<1x32xf32>
    %213 = arith.mulf %211, %190 : vector<1x32xf32>
    %cst_57 = arith.constant dense<0.000000e+00> : vector<1x32xf32>
    %214 = tpu.matmul %213, %8, %cst_57 {dimension_numbers = #tpu.dot_dimension_numbers<[1], [0], [0], [1], [0, 0, 1, 1], [], []>} : vector<1x32xf32>, vector<32x32xf32>, vector<1x32xf32> -> vector<1x32xf32>
    %215 = arith.addf %212, %214 : vector<1x32xf32>
    %216 = math.tanh %215 : vector<1x32xf32>
    %217 = arith.mulf %210, %190 : vector<1x32xf32>
    %cst_58 = arith.constant 1.000000e+00 : f32
    %218 = vector.broadcast %cst_58 : f32 to vector<1x32xf32>
    %219 = arith.subf %218, %210 : vector<1x32xf32>
    %220 = arith.mulf %219, %216 : vector<1x32xf32>
    %221 = arith.addf %217, %220 : vector<1x32xf32>
    %cst_59 = arith.constant dense<0.000000e+00> : vector<1x1xf32>
    %222 = tpu.matmul %221, %9, %cst_59 {dimension_numbers = #tpu.dot_dimension_numbers<[1], [0], [0], [1], [0, 0, 1, 1], [], []>} : vector<1x32xf32>, vector<32x1xf32>, vector<1x1xf32> -> vector<1x1xf32>
    %223 = arith.addf %222, %10 : vector<1x1xf32>
    %224 = vector.broadcast %c6_i32 : i32 to vector<1x128xi32>
    %225 = arith.cmpi eq, %11, %224 : vector<1x128xi32>
    %226 = arith.extui %225 : vector<1x128xi1> to vector<1x128xi32>
    %227 = arith.sitofp %226 : vector<1x128xi32> to vector<1x128xf32>
    %228 = vector.broadcast %223 : vector<1x1xf32> to vector<1x128xf32>
    %229 = arith.mulf %227, %228 : vector<1x128xf32>
    %230 = arith.addf %199, %229 : vector<1x128xf32>
    %c7_i32 = arith.constant 7 : i32
    %231 = arith.index_cast %c7_i32 : i32 to index
    %c0_60 = arith.constant 0 : index
    %232 = vector.load %arg10[%231, %c0_60] : memref<8x96xf32, #tpu.memory_space<vmem>>, vector<1x96xf32>
    %cst_61 = arith.constant dense<0.000000e+00> : vector<1x64xf32>
    %233 = tpu.matmul %221, %7, %cst_61 {dimension_numbers = #tpu.dot_dimension_numbers<[1], [0], [0], [1], [0, 0, 1, 1], [], []>} : vector<1x32xf32>, vector<32x64xf32>, vector<1x64xf32> -> vector<1x64xf32>
    %234 = vector.extract_strided_slice %232 {offsets = [0, 0], sizes = [1, 64], strides = [1, 1]} : vector<1x96xf32> to vector<1x64xf32>
    %235 = arith.addf %234, %233 : vector<1x64xf32>
    %236 = arith.negf %235 : vector<1x64xf32>
    %237 = math.exp %236 : vector<1x64xf32>
    %cst_62 = arith.constant 1.000000e+00 : f32
    %238 = vector.broadcast %cst_62 : f32 to vector<1x64xf32>
    %239 = arith.addf %238, %237 : vector<1x64xf32>
    %240 = arith.divf %238, %239 : vector<1x64xf32>
    %241 = vector.extract_strided_slice %240 {offsets = [0, 0], sizes = [1, 32], strides = [1, 1]} : vector<1x64xf32> to vector<1x32xf32>
    %242 = vector.extract_strided_slice %240 {offsets = [0, 32], sizes = [1, 32], strides = [1, 1]} : vector<1x64xf32> to vector<1x32xf32>
    %243 = vector.extract_strided_slice %232 {offsets = [0, 64], sizes = [1, 32], strides = [1, 1]} : vector<1x96xf32> to vector<1x32xf32>
    %244 = arith.mulf %242, %221 : vector<1x32xf32>
    %cst_63 = arith.constant dense<0.000000e+00> : vector<1x32xf32>
    %245 = tpu.matmul %244, %8, %cst_63 {dimension_numbers = #tpu.dot_dimension_numbers<[1], [0], [0], [1], [0, 0, 1, 1], [], []>} : vector<1x32xf32>, vector<32x32xf32>, vector<1x32xf32> -> vector<1x32xf32>
    %246 = arith.addf %243, %245 : vector<1x32xf32>
    %247 = math.tanh %246 : vector<1x32xf32>
    %248 = arith.mulf %241, %221 : vector<1x32xf32>
    %cst_64 = arith.constant 1.000000e+00 : f32
    %249 = vector.broadcast %cst_64 : f32 to vector<1x32xf32>
    %250 = arith.subf %249, %241 : vector<1x32xf32>
    %251 = arith.mulf %250, %247 : vector<1x32xf32>
    %252 = arith.addf %248, %251 : vector<1x32xf32>
    %cst_65 = arith.constant dense<0.000000e+00> : vector<1x1xf32>
    %253 = tpu.matmul %252, %9, %cst_65 {dimension_numbers = #tpu.dot_dimension_numbers<[1], [0], [0], [1], [0, 0, 1, 1], [], []>} : vector<1x32xf32>, vector<32x1xf32>, vector<1x1xf32> -> vector<1x1xf32>
    %254 = arith.addf %253, %10 : vector<1x1xf32>
    %255 = vector.broadcast %c7_i32 : i32 to vector<1x128xi32>
    %256 = arith.cmpi eq, %11, %255 : vector<1x128xi32>
    %257 = arith.extui %256 : vector<1x128xi1> to vector<1x128xi32>
    %258 = arith.sitofp %257 : vector<1x128xi32> to vector<1x128xf32>
    %259 = vector.broadcast %254 : vector<1x1xf32> to vector<1x128xf32>
    %260 = arith.mulf %258, %259 : vector<1x128xf32>
    %261 = arith.addf %230, %260 : vector<1x128xf32>
    %c8_i32 = arith.constant 8 : i32
    %c0_66 = arith.constant 0 : index
    %c0_67 = arith.constant 0 : index
    %262 = vector.load %arg8[%c0_66, %c0_67] : memref<1x128xf32, #tpu.memory_space<vmem>>, vector<1x128xf32>
    tpu.vector_store %arg8[%c0_66, %c0_67], %261 {strides = array<i32>} : memref<1x128xf32, #tpu.memory_space<vmem>>, vector<1x128xf32>,
    %c0_68 = arith.constant 0 : index
    %c0_69 = arith.constant 0 : index
    %263 = vector.load %arg9[%c0_68, %c0_69] : memref<1x32xf32, #tpu.memory_space<vmem>>, vector<1x32xf32>
    tpu.vector_store %arg9[%c0_68, %c0_69], %252 {strides = array<i32>} : memref<1x32xf32, #tpu.memory_space<vmem>>, vector<1x32xf32>,
    return
  }
}

</mosaic_0001>

<bundles_post_ra>
// kernel: tpu_custom_call.1
= control target key start
LH: loop header
LB: loop body
LE: loop exit
PB: predicated region body
PF: predicated region fallthrough
CT: control target
= control target key end

     0   :  { %s3290_s0 = inlined_call_operand.vmem [shape: f32[8,8], index: 0, kind: input, shape index: {}]   ;;  %s3291_s1 = inlined_call_operand.vmem [shape: f32[1,32], index: 1, kind: input, shape index: {}]   ;;  %s3292_s2 = inlined_call_operand.hbm [shape: f32[8,96], index: 2, kind: input, shape index: {}]   ;;  %s3293_s3 = inlined_call_operand.vmem [shape: f32[1,96], index: 3, kind: input, shape index: {}]   ;;  %s3294_s4 = inlined_call_operand.vmem [shape: f32[32,64], index: 4, kind: input, shape index: {}]   ;;  %s3295_s5 = inlined_call_operand.hbm [shape: f32[32,32], index: 5, kind: input, shape index: {}]   ;;  %s3296_s6 = inlined_call_operand.vmem [shape: f32[32,1], index: 6, kind: input, shape index: {}]   ;;  %s3297_s7 = inlined_call_operand.<no memory space> [shape: f32[1,1], index: 7, kind: input, shape index: {}]   ;;  %s3298_s8 = inlined_call_operand.hbm [shape: f32[1,128], index: 8, kind: output, shape index: {0}]   ;;  %s3299_s9 = inlined_call_operand.hbm [shape: f32[1,32], index: 9, kind: output, shape index: {1}]  }
   0x1   :  { %v15_v0 = vstv %s3297_s7 }
   0x2   :  { %16 = vst [vmem:[#allocation3] sm:$0x1] %v15_v0 }
   0x3   :  { %17 = vsyncpa [#allocation5], 0 }
   0x4   :  { %18 = vsyncpa [#allocation8], 0 }
   0x5   :  { %19 = vsyncpa [#allocation6], 0 }
   0x6   :  { %20 = vsyncpa [#allocation11], 0  ;;  %s2818_s11 = smov [#allocation4]   ;;  %s2819_s13 = smov [#allocation7]  }
   0x7   :  { %s31_s12 = sshll.u32 %s2818_s11, 4  ;;  %s44_s14 = sshll.u32 %s2819_s13, 4  ;;  %s32_s12 = int_to_ptr.vmem [resolvable:$true] %s31_s12  ;;  %s45_s14 = int_to_ptr.vmem [resolvable:$true] %s44_s14 }
   0x8   :  { %s2738_s15 = scalar_lea.vmem %s32_s12, 128  ;;  %p2743_p1 = scmp.lt.s32.totalorder %s32_s12, %s32_s12 }
   0x9   :  { %p2739_p0 = scmp.ne.s32.totalorder %s32_s12, %s2738_s15  ;;  %p2744_p2 = scmp.lt.s32.totalorder %s2738_s15, %s2738_s15 }
   0xb   :  { %p2745_p3 = por %p2744_p2, %p2743_p1 }
   0xd   :  { %p2746_p4 = pnand %p2745_p3, %p2739_p0 }
   0xf   :  { %2749 = shalt.err (!%p2746_p4)
}
  0x10   :  { %34 = dma.hbm_to_vmem [thread:$0]  %s3292_s2, 128, %s32_s12, [#allocation5]  }
  0x11   :  { %s2758_s17 = scalar_lea.vmem %s45_s14, 512  ;;  %p2763_p6 = scmp.lt.s32.totalorder %s45_s14, %s45_s14 }
  0x12   :  { %p2759_p5 = scmp.ne.s32.totalorder %s45_s14, %s2758_s17  ;;  %p2764_p7 = scmp.lt.s32.totalorder %s2758_s17, %s2758_s17 }
  0x14   :  { %p2765_p8 = por %p2764_p7, %p2763_p6 }
  0x16   :  { %p2766_p9 = pnand %p2765_p8, %p2759_p5 }
  0x18   :  { %2769 = shalt.err (!%p2766_p9)
}
  0x19   :  { %s2820_s18 = smov 128   ;;  %s2821_s19 = smov 8  }
  0x1a   :  { %50 = dma.hbm_to_vmem [thread:$0]  %s3295_s5, 512, %s45_s14, [#allocation8], %s2820_s18, %s2820_s18, %s2821_s19  }
  0x1b   :  { %2810 = dma.done.wait [#allocation5], 128  }
  0x1c   :  { %2811 = vsyncadd [#allocation5], 4294967168 }
  0x1d   :  { %2812 = dma.done.wait [#allocation8], 512  }
  0x1e   :  { %2813 = vsyncadd [#allocation8], 4294966784  ;;  %v2822_v1 = vmov 0.0   ;;  %vm2823_vm0 = vmmov 0   ;;  %v159_v2 = vlaneseq  ;;  %vm70_vm1 = vcmask 64512   ;;  %v62_v5 = vld [vmem:[#allocation4] sm:$0xff] }
  0x1f   :  { %2399 = vmatprep.subr.mxu0 %v2822_v1  ;;  %2401 = vmatprep.mubr.msk.f32.mxu0 %vm2823_vm0, %v2822_v1  ;;  %v61_v6 = vld [vmem:[%s3290_s0] sm:$0xff]  ;;  %v2902_v7 = vld [vmem:[%s3294_s4 + $0x18] sm:$0xff]  ;;  %v2908_v8 = vld [vmem:[%s3294_s4 + $0x10] sm:$0xff]  ;;  %vm163_vm2 = vcmask 261120   ;;  %vm144_vm3 = vcmask 785408   ;;  %s2825_s11 = smov 96  }
  0x20   :  { %2404 = vmatprep.subr.mxu1 %v2822_v1  ;;  %2412 = vmatprep.mubr.msk.f32.mxu1 %vm2823_vm0, %v2822_v1  ;;  %v245_v3 = vshrl.u32 %v159_v2, 7  ;;  %v2914_v9 = vld [vmem:[%s3294_s4 + $0x8] sm:$0xff]  ;;  %v2919_v10 = vld [vmem:[%s3291_s1] sm:$0x1]  ;;  %s2824_s1 = smov 32   ;;  %v2951_v16 = vld [vmem:[#allocation7] sm:$0xff] }
  0x21   :  { %2400 = vmatpush3.msra.mxu0 %v62_v5  ;;  %2405 = vmatpush3.msra.mxu1 %v2902_v7  ;;  %v2928_v12 = vld [vmem:[%s3294_s4] sm:$0xff]  ;;  %v2941_v13 = vld [vmem:[#allocation7 + $0x18] sm:$0xff]  ;;  %v2976_v34 = vld [vmem:[%s3296_s6 + $0x18] sm:$0xff]  ;;  %vm2203_vm4 = vcmask 253952  }
  0x22   :  { %v246_v4 = vsub.s32 0, %v245_v3  ;;  %2402 = vmatmul.mubr.msk.f32.vlgmr.msra.gmra.mxu0 %vm70_vm1, %v61_v6  ;;  %2406 = vmatprep.subr.mxu1 %v2822_v1  ;;  %v2943_v14 = vld [vmem:[#allocation7 + $0x10] sm:$0xff]  ;;  %v2947_v15 = vld [vmem:[#allocation7 + $0x8] sm:$0xff]  ;;  %v2981_v35 = vld [vmem:[%s3296_s6 + $0x10] sm:$0xff] }
  0x23   :  { %2407 = vmatpush3.msra.mxu1 %v2908_v8  ;;  %2415 = vmatprep.subr.mxu0 %v2822_v1  ;;  %v2235_v17 = vld [vmem:[%s3293_s3] ss:$0 sm:$0xff]  ;;  %s2826_s3 = smov 64   ;;  %v2990_v38 = vld [vmem:[%s3296_s6 + $0x8] sm:$0xff] }
  0x24   :  { %v247_v11 = vrot.slane %v2919_v10, %v246_v4  ;;  %2408 = vmatprep.subr.mxu1 %v2822_v1  ;;  %2423 = vmatprep.mubr.msk.f32.mxu0 %vm2823_vm0, %v2822_v1  ;;  %v2997_v39 = vld [vmem:[%s3296_s6] sm:$0xff]  ;;  %s2828_s6 = smov [#allocation10]  }
  0x25   :  { %2409 = vmatpush3.msra.mxu1 %v2914_v9  ;;  %2416 = vmatpush3.msra.mxu0 %v2941_v13  ;;  %s2221_s19 = sshll.u32 %s2828_s6, 4  ;;  %s2222_s19 = int_to_ptr.vmem [resolvable:$true] %s2221_s19 }
  0x26   :  { %248 = vrot.lane.b32.xlu0 %v247_v11, %s2824_s1  ;;  %2410 = vmatprep.subr.mxu1 %v2822_v1  ;;  %s2770_s20 = scalar_lea.vmem %s2222_s19, 16  ;;  %s2774_s21 = scalar_lea.vmem %s2222_s19, 32 }
  0x27   :  { %2411 = vmatpush3.msra.mxu1 %v2928_v12  ;;  %2417 = vmatprep.subr.mxu0 %v2822_v1  ;;  %p2771_p10 = scmp.ne.s32.totalorder %s2222_s19, %s2770_s20  ;;  %p2775_p11 = scmp.lt.s32.totalorder %s2222_s19, %s2222_s19 }
  0x28   :  { %2413 = vmatmul.mubr.msk.f32.vlgmr.msra.gmra.mxu1 %vm163_vm2, %v2919_v10  ;;  %2426 = vmatprep.subr.mxu1 %v2822_v1  ;;  %p2776_p12 = scmp.lt.s32.totalorder %s2774_s21, %s2770_s20 }
  0x29   :  { %2434 = vmatprep.mubr.msk.f32.mxu1 %vm2823_vm0, %v2822_v1  ;;  %2418 = vmatpush3.msra.mxu0 %v2943_v14 }
  0x2a   :  { %2419 = vmatprep.subr.mxu0 %v2822_v1  ;;  %2427 = vmatpush3.msra.mxu1 %v2976_v34  ;;  %p2777_p13 = por %p2776_p12, %p2775_p11 }
  0x2b   :  { %2420 = vmatpush3.msra.mxu0 %v2947_v15  ;;  %2428 = vmatprep.subr.mxu1 %v2822_v1 }
  0x2c   :  { %2421 = vmatprep.subr.mxu0 %v2822_v1  ;;  %2429 = vmatpush3.msra.mxu1 %v2981_v35  ;;  %p2778_p0 = pnand %p2777_p13, %p2771_p10 }
  0x2d   :  { %2422 = vmatpush3.msra.mxu0 %v2951_v16  ;;  %2430 = vmatprep.subr.mxu1 %v2822_v1 }
  0x2e   :  { %2437 = vmatprep.subr.mxu0 %v2822_v1  ;;  %2431 = vmatpush3.msra.mxu1 %v2990_v38 }
  0x2f   :  { %2432 = vmatprep.subr.mxu1 %v2822_v1 }
  0x30   :  { %2433 = vmatpush3.msra.mxu1 %v2997_v39 }
  0x31   :  { %2448 = vmatprep.subr.mxu1 %v2822_v1 }
  0x98   :  { %v249_v28 = vpop.permute.xlu0 %248 }
  0xe2   :  { %v140_v18 = vpop.f32.mrf.mxu0 }
  0xe3   :  { %v141_v19 = vadd.f32 %v2235_v17, %v140_v18 }
  0xe4   :  { %v2403_v20 = vpop.f32.mrf.mxu0 }
  0xe5   :  { %145 = vst.msk [vmem:[#allocation2] sm:$0xff] %vm144_vm3, %v141_v19 }
  0xe8   :  { %v233_v21 = vpop.f32.mrf.mxu1 }
  0xea   :  { %v2414_v22 = vpop.f32.mrf.mxu1 }
  0xec   :  { %v162_v23 = vld [vmem:[#allocation2] sm:$0x1]  ;;  %v424_v47 = vld [vmem:[#allocation2 + $0x1] sm:$0x1]  ;;  %v678_v11 = vld [vmem:[#allocation2 + $0x2] sm:$0x1] }
  0xed   :  { %v237_v24 = vadd.f32 %v233_v21, %v162_v23 }
  0xef   :  { %v2238_v25 = vmul.f32 -1.442695, %v237_v24 }
  0xf1   :  { %2682 = vpow2.f32 %v2238_v25 }
  0xfe   :  { %v2683_v26 = vpop.eup %2682 }
  0xff   :  { %v241_v27 = vadd.f32 1.0, %v2683_v26 }
 0x101   :  { %2684 = vrcp.f32 %v241_v27 }
 0x10e   :  { %v2685_v29 = vpop.eup %2684 }
 0x10f   :  { %v251_v30 = vmul.f32 %v2685_v29, %v249_v28  ;;  %v334_v41 = vsub.f32 1.0, %v2685_v29  ;;  %v333_v43 = vmul.f32 %v2685_v29, %v2919_v10 }
 0x111   :  { %253 = vrot.lane.b32.xlu0 %v251_v30, %s2825_s11 }
 0x183   :  { %v254_v31 = vpop.permute.xlu0 %253 }
 0x184   :  { %2424 = vmatmul.mubr.msk.f32.vlgmr.msra.gmra.mxu0 %vm163_vm2, %v254_v31 }
 0x185   :  { %2438 = vmatpush3.msra.mxu0 %v2902_v7  ;;  %2445 = vmatprep.mubr.msk.f32.mxu0 %vm2823_vm0, %v2822_v1 }
 0x186   :  { %2439 = vmatprep.subr.mxu0 %v2822_v1 }
 0x187   :  { %2440 = vmatpush3.msra.mxu0 %v2908_v8 }
 0x188   :  { %2441 = vmatprep.subr.mxu0 %v2822_v1 }
 0x189   :  { %2442 = vmatpush3.msra.mxu0 %v2914_v9 }
 0x18a   :  { %2443 = vmatprep.subr.mxu0 %v2822_v1 }
 0x18b   :  { %2444 = vmatpush3.msra.mxu0 %v2928_v12 }
 0x18c   :  { %2459 = vmatprep.subr.mxu0 %v2822_v1 }
 0x244   :  { %v323_v32 = vpop.f32.mrf.mxu0 }
 0x245   :  { %328 = vrot.lane.b32.xlu1 %v323_v32, %s2826_s3 }
 0x246   :  { %v2425_v33 = vpop.f32.mrf.mxu0 }
 0x2b7   :  { %v329_v36 = vpop.permute.xlu1 %328 }
 0x2b8   :  { %v331_v37 = vadd.f32 %v329_v36, %v162_v23 }
 0x2ba   :  { %2686 = vtanh.f32 %v331_v37 }
 0x2c7   :  { %v2687_v40 = vpop.eup %2686 }
 0x2c8   :  { %336 = vrot.lane.b32.xlu1 %v2687_v40, %s2826_s3 }
 0x33a   :  { %v337_v42 = vpop.permute.xlu1 %336 }
 0x33b   :  { %v339_v44 = vmul.f32 %v337_v42, %v334_v41 }
 0x33d   :  { %v340_v45 = vadd.f32 %v339_v44, %v333_v43  ;;  %v932_v43 = vld [vmem:[#allocation2 + $0x3] sm:$0x1] }
 0x33f   :  { %502 = vrot.lane.b32.xlu0 %v340_v45, %s2824_s1  ;;  %2435 = vmatmul.mubr.msk.f32.vlgmr.msra.gmra.mxu1 %vm163_vm2, %v340_v45 }
 0x340   :  { %2446 = vmatmul.mubr.msk.f32.vlgmr.msra.gmra.mxu0 %vm163_vm2, %v340_v45  ;;  %2449 = vmatpush3.msra.mxu1 %v2941_v13 }
 0x341   :  { %2450 = vmatprep.subr.mxu1 %v2822_v1  ;;  %2456 = vmatprep.mubr.msk.f32.mxu1 %vm2823_vm0, %v2822_v1 }
 0x342   :  { %2451 = vmatpush3.msra.mxu1 %v2943_v14  ;;  %2460 = vmatpush3.msra.mxu0 %v2976_v34 }
 0x343   :  { %2452 = vmatprep.subr.mxu1 %v2822_v1  ;;  %2461 = vmatprep.subr.mxu0 %v2822_v1 }
 0x344   :  { %2453 = vmatpush3.msra.mxu1 %v2947_v15  ;;  %2462 = vmatpush3.msra.mxu0 %v2981_v35 }
 0x345   :  { %2454 = vmatprep.subr.mxu1 %v2822_v1  ;;  %2463 = vmatprep.subr.mxu0 %v2822_v1 }
 0x346   :  { %2455 = vmatpush3.msra.mxu1 %v2951_v16  ;;  %2464 = vmatpush3.msra.mxu0 %v2990_v38 }
 0x347   :  { %2470 = vmatprep.subr.mxu1 %v2822_v1  ;;  %2465 = vmatprep.subr.mxu0 %v2822_v1 }
 0x348   :  { %2466 = vmatpush3.msra.mxu0 %v2997_v39  ;;  %2467 = vmatprep.mubr.msk.f32.mxu0 %vm2823_vm0, %v2822_v1 }
 0x349   :  { %2481 = vmatprep.subr.mxu0 %v2822_v1 }
 0x3b1   :  { %v503_v56 = vpop.permute.xlu0 %502 }
 0x3ff   :  { %v3026_v46 = vpop.f32.mrf.mxu1 }
 0x400   :  { %v491_v48 = vpop.f32.mrf.mxu0 }
 0x401   :  { %v495_v49 = vadd.f32 %v491_v48, %v424_v47  ;;  %v2436_v50 = vpop.f32.mrf.mxu1 }
 0x402   :  { %v2447_v51 = vpop.f32.mrf.mxu0 }
 0x403   :  { %v2243_v52 = vmul.f32 -1.442695, %v495_v49 }
 0x405   :  { %2688 = vpow2.f32 %v2243_v52 }
 0x412   :  { %v2689_v53 = vpop.eup %2688 }
 0x413   :  { %v499_v54 = vadd.f32 1.0, %v2689_v53 }
 0x415   :  { %2690 = vrcp.f32 %v499_v54 }
 0x422   :  { %v2691_v55 = vpop.eup %2690 }
 0x423   :  { %v505_v57 = vmul.f32 %v2691_v55, %v503_v56  ;;  %v588_v0 = vsub.f32 1.0, %v2691_v55  ;;  %v587_v4 = vmul.f32 %v2691_v55, %v340_v45 }
 0x425   :  { %507 = vrot.lane.b32.xlu1 %v505_v57, %s2825_s11 }
 0x497   :  { %v508_v58 = vpop.permute.xlu1 %507 }
 0x498   :  { %2457 = vmatmul.mubr.msk.f32.vlgmr.msra.gmra.mxu1 %vm163_vm2, %v508_v58 }
 0x499   :  { %2471 = vmatpush3.msra.mxu1 %v2902_v7  ;;  %2478 = vmatprep.mubr.msk.f32.mxu1 %vm2823_vm0, %v2822_v1 }
 0x49a   :  { %2472 = vmatprep.subr.mxu1 %v2822_v1 }
 0x49b   :  { %2473 = vmatpush3.msra.mxu1 %v2908_v8 }
 0x49c   :  { %2474 = vmatprep.subr.mxu1 %v2822_v1 }
 0x49d   :  { %2475 = vmatpush3.msra.mxu1 %v2914_v9 }
 0x49e   :  { %2476 = vmatprep.subr.mxu1 %v2822_v1 }
 0x49f   :  { %2477 = vmatpush3.msra.mxu1 %v2928_v12 }
 0x4a0   :  { %2492 = vmatprep.subr.mxu1 %v2822_v1 }
 0x558   :  { %v577_v59 = vpop.f32.mrf.mxu1 }
 0x559   :  { %582 = vrot.lane.b32.xlu0 %v577_v59, %s2826_s3 }
 0x55a   :  { %v2458_v60 = vpop.f32.mrf.mxu1 }
 0x5cb   :  { %v583_v61 = vpop.permute.xlu0 %582 }
 0x5cc   :  { %v585_v62 = vadd.f32 %v583_v61, %v424_v47 }
 0x5ce   :  { %2692 = vtanh.f32 %v585_v62 }
 0x5db   :  { %v2693_v63 = vpop.eup %2692 }
 0x5dc   :  { %590 = vrot.lane.b32.xlu1 %v2693_v63, %s2826_s3 }
 0x64e   :  { %v591_v3 = vpop.permute.xlu1 %590 }
 0x64f   :  { %v593_v5 = vmul.f32 %v591_v3, %v588_v0 }
 0x651   :  { %v594_v6 = vadd.f32 %v593_v5, %v587_v4  ;;  %v1186_v5 = vld [vmem:[#allocation2 + $0x4] sm:$0x1] }
 0x653   :  { %756 = vrot.lane.b32.xlu0 %v594_v6, %s2824_s1  ;;  %2468 = vmatmul.mubr.msk.f32.vlgmr.msra.gmra.mxu0 %vm163_vm2, %v594_v6 }
 0x654   :  { %2479 = vmatmul.mubr.msk.f32.vlgmr.msra.gmra.mxu1 %vm163_vm2, %v594_v6  ;;  %2482 = vmatpush3.msra.mxu0 %v2941_v13 }
 0x655   :  { %2483 = vmatprep.subr.mxu0 %v2822_v1  ;;  %2489 = vmatprep.mubr.msk.f32.mxu0 %vm2823_vm0, %v2822_v1 }
 0x656   :  { %2484 = vmatpush3.msra.mxu0 %v2943_v14  ;;  %2493 = vmatpush3.msra.mxu1 %v2976_v34 }
 0x657   :  { %2485 = vmatprep.subr.mxu0 %v2822_v1  ;;  %2494 = vmatprep.subr.mxu1 %v2822_v1 }
 0x658   :  { %2486 = vmatpush3.msra.mxu0 %v2947_v15  ;;  %2495 = vmatpush3.msra.mxu1 %v2981_v35 }
 0x659   :  { %2487 = vmatprep.subr.mxu0 %v2822_v1  ;;  %2496 = vmatprep.subr.mxu1 %v2822_v1 }
 0x65a   :  { %2488 = vmatpush3.msra.mxu0 %v2951_v16  ;;  %2497 = vmatpush3.msra.mxu1 %v2990_v38 }
 0x65b   :  { %2503 = vmatprep.subr.mxu0 %v2822_v1  ;;  %2498 = vmatprep.subr.mxu1 %v2822_v1 }
 0x65c   :  { %2499 = vmatpush3.msra.mxu1 %v2997_v39  ;;  %2500 = vmatprep.mubr.msk.f32.mxu1 %vm2823_vm0, %v2822_v1 }
 0x65d   :  { %2514 = vmatprep.subr.mxu1 %v2822_v1 }
 0x6c5   :  { %v757_v25 = vpop.permute.xlu0 %756 }
 0x713   :  { %v3065_v10 = vpop.f32.mrf.mxu0 }
 0x714   :  { %v745_v17 = vpop.f32.mrf.mxu1 }
 0x715   :  { %v749_v18 = vadd.f32 %v745_v17, %v678_v11  ;;  %v2469_v19 = vpop.f32.mrf.mxu0 }
 0x716   :  { %v2480_v20 = vpop.f32.mrf.mxu1 }
 0x717   :  { %v2248_v21 = vmul.f32 -1.442695, %v749_v18 }
 0x719   :  { %2694 = vpow2.f32 %v2248_v21 }
 0x726   :  { %v2695_v22 = vpop.eup %2694 }
 0x727   :  { %v753_v23 = vadd.f32 1.0, %v2695_v22 }
 0x729   :  { %2696 = vrcp.f32 %v753_v23 }
 0x736   :  { %v2697_v24 = vpop.eup %2696 }
 0x737   :  { %v759_v26 = vmul.f32 %v2697_v24, %v757_v25  ;;  %v842_v33 = vsub.f32 1.0, %v2697_v24  ;;  %v841_v37 = vmul.f32 %v2697_v24, %v594_v6 }
 0x739   :  { %761 = vrot.lane.b32.xlu1 %v759_v26, %s2825_s11 }
 0x7ab   :  { %v762_v27 = vpop.permute.xlu1 %761 }
 0x7ac   :  { %2490 = vmatmul.mubr.msk.f32.vlgmr.msra.gmra.mxu0 %vm163_vm2, %v762_v27 }
 0x7ad   :  { %2504 = vmatpush3.msra.mxu0 %v2902_v7  ;;  %2511 = vmatprep.mubr.msk.f32.mxu0 %vm2823_vm0, %v2822_v1 }
 0x7ae   :  { %2505 = vmatprep.subr.mxu0 %v2822_v1 }
 0x7af   :  { %2506 = vmatpush3.msra.mxu0 %v2908_v8 }
 0x7b0   :  { %2507 = vmatprep.subr.mxu0 %v2822_v1 }
 0x7b1   :  { %2508 = vmatpush3.msra.mxu0 %v2914_v9 }
 0x7b2   :  { %2509 = vmatprep.subr.mxu0 %v2822_v1 }
 0x7b3   :  { %2510 = vmatpush3.msra.mxu0 %v2928_v12 }
 0x7b4   :  { %2525 = vmatprep.subr.mxu0 %v2822_v1 }
 0x86c   :  { %v831_v28 = vpop.f32.mrf.mxu0 }
 0x86d   :  { %836 = vrot.lane.b32.xlu0 %v831_v28, %s2826_s3 }
 0x86e   :  { %v2491_v29 = vpop.f32.mrf.mxu0 }
 0x8df   :  { %v837_v30 = vpop.permute.xlu0 %836 }
 0x8e0   :  { %v839_v31 = vadd.f32 %v837_v30, %v678_v11 }
 0x8e2   :  { %2698 = vtanh.f32 %v839_v31 }
 0x8ef   :  { %v2699_v32 = vpop.eup %2698 }
 0x8f0   :  { %844 = vrot.lane.b32.xlu1 %v2699_v32, %s2826_s3 }
 0x962   :  { %v845_v36 = vpop.permute.xlu1 %844 }
 0x963   :  { %v847_v40 = vmul.f32 %v845_v36, %v842_v33 }
 0x965   :  { %v848_v41 = vadd.f32 %v847_v40, %v841_v37 }
 0x967   :  { %1010 = vrot.lane.b32.xlu0 %v848_v41, %s2824_s1  ;;  %2501 = vmatmul.mubr.msk.f32.vlgmr.msra.gmra.mxu1 %vm163_vm2, %v848_v41 }
 0x968   :  { %2512 = vmatmul.mubr.msk.f32.vlgmr.msra.gmra.mxu0 %vm163_vm2, %v848_v41  ;;  %2515 = vmatpush3.msra.mxu1 %v2941_v13 }
 0x969   :  { %2516 = vmatprep.subr.mxu1 %v2822_v1  ;;  %2522 = vmatprep.mubr.msk.f32.mxu1 %vm2823_vm0, %v2822_v1 }
 0x96a   :  { %2517 = vmatpush3.msra.mxu1 %v2943_v14  ;;  %2526 = vmatpush3.msra.mxu0 %v2976_v34 }
 0x96b   :  { %2518 = vmatprep.subr.mxu1 %v2822_v1  ;;  %2527 = vmatprep.subr.mxu0 %v2822_v1 }
 0x96c   :  { %2519 = vmatpush3.msra.mxu1 %v2947_v15  ;;  %2528 = vmatpush3.msra.mxu0 %v2981_v35 }
 0x96d   :  { %2520 = vmatprep.subr.mxu1 %v2822_v1  ;;  %2529 = vmatprep.subr.mxu0 %v2822_v1 }
 0x96e   :  { %2521 = vmatpush3.msra.mxu1 %v2951_v16  ;;  %2530 = vmatpush3.msra.mxu0 %v2990_v38 }
 0x96f   :  { %2536 = vmatprep.subr.mxu1 %v2822_v1  ;;  %2531 = vmatprep.subr.mxu0 %v2822_v1 }
 0x970   :  { %2532 = vmatpush3.msra.mxu0 %v2997_v39  ;;  %2533 = vmatprep.mubr.msk.f32.mxu0 %vm2823_vm0, %v2822_v1 }
 0x971   :  { %2547 = vmatprep.subr.mxu0 %v2822_v1 }
 0x9d9   :  { %v1011_v53 = vpop.permute.xlu0 %1010 }
 0xa27   :  { %v3104_v42 = vpop.f32.mrf.mxu1 }
 0xa28   :  { %v999_v44 = vpop.f32.mrf.mxu0 }
 0xa29   :  { %v1003_v45 = vadd.f32 %v999_v44, %v932_v43  ;;  %v2502_v47 = vpop.f32.mrf.mxu1 }
 0xa2a   :  { %v2513_v48 = vpop.f32.mrf.mxu0 }
 0xa2b   :  { %v2253_v49 = vmul.f32 -1.442695, %v1003_v45 }
 0xa2d   :  { %2700 = vpow2.f32 %v2253_v49 }
 0xa3a   :  { %v2701_v50 = vpop.eup %2700 }
 0xa3b   :  { %v1007_v51 = vadd.f32 1.0, %v2701_v50 }
 0xa3d   :  { %2702 = vrcp.f32 %v1007_v51 }
 0xa4a   :  { %v2703_v52 = vpop.eup %2702 }
 0xa4b   :  { %v1013_v54 = vmul.f32 %v2703_v52, %v1011_v53  ;;  %v1096_v61 = vsub.f32 1.0, %v2703_v52  ;;  %v1095_v63 = vmul.f32 %v2703_v52, %v848_v41  ;;  %v1440_v41 = vld [vmem:[#allocation2 + $0x5] sm:$0x1] }
 0xa4d   :  { %1015 = vrot.lane.b32.xlu1 %v1013_v54, %s2825_s11 }
 0xabf   :  { %v1016_v55 = vpop.permute.xlu1 %1015 }
 0xac0   :  { %2523 = vmatmul.mubr.msk.f32.vlgmr.msra.gmra.mxu1 %vm163_vm2, %v1016_v55 }
 0xac1   :  { %2537 = vmatpush3.msra.mxu1 %v2902_v7  ;;  %2544 = vmatprep.mubr.msk.f32.mxu1 %vm2823_vm0, %v2822_v1 }
 0xac2   :  { %2538 = vmatprep.subr.mxu1 %v2822_v1 }
 0xac3   :  { %2539 = vmatpush3.msra.mxu1 %v2908_v8 }
 0xac4   :  { %2540 = vmatprep.subr.mxu1 %v2822_v1 }
 0xac5   :  { %2541 = vmatpush3.msra.mxu1 %v2914_v9 }
 0xac6   :  { %2542 = vmatprep.subr.mxu1 %v2822_v1 }
 0xac7   :  { %2543 = vmatpush3.msra.mxu1 %v2928_v12 }
 0xac8   :  { %2558 = vmatprep.subr.mxu1 %v2822_v1 }
 0xb80   :  { %v1085_v56 = vpop.f32.mrf.mxu1 }
 0xb81   :  { %1090 = vrot.lane.b32.xlu0 %v1085_v56, %s2826_s3 }
 0xb82   :  { %v2524_v57 = vpop.f32.mrf.mxu1 }
 0xbf3   :  { %v1091_v58 = vpop.permute.xlu0 %1090 }
 0xbf4   :  { %v1093_v59 = vadd.f32 %v1091_v58, %v932_v43 }
 0xbf6   :  { %2704 = vtanh.f32 %v1093_v59 }
 0xc03   :  { %v2705_v60 = vpop.eup %2704 }
 0xc04   :  { %1098 = vrot.lane.b32.xlu1 %v2705_v60, %s2826_s3 }
 0xc76   :  { %v1099_v62 = vpop.permute.xlu1 %1098 }
 0xc77   :  { %v1101_v0 = vmul.f32 %v1099_v62, %v1096_v61 }
 0xc79   :  { %v1102_v3 = vadd.f32 %v1101_v0, %v1095_v63 }
 0xc7b   :  { %1264 = vrot.lane.b32.xlu0 %v1102_v3, %s2824_s1  ;;  %2534 = vmatmul.mubr.msk.f32.vlgmr.msra.gmra.mxu0 %vm163_vm2, %v1102_v3 }
 0xc7c   :  { %2545 = vmatmul.mubr.msk.f32.vlgmr.msra.gmra.mxu1 %vm163_vm2, %v1102_v3  ;;  %2548 = vmatpush3.msra.mxu0 %v2941_v13 }
 0xc7d   :  { %2549 = vmatprep.subr.mxu0 %v2822_v1  ;;  %2555 = vmatprep.mubr.msk.f32.mxu0 %vm2823_vm0, %v2822_v1 }
 0xc7e   :  { %2550 = vmatpush3.msra.mxu0 %v2943_v14  ;;  %2559 = vmatpush3.msra.mxu1 %v2976_v34 }
 0xc7f   :  { %2551 = vmatprep.subr.mxu0 %v2822_v1  ;;  %2560 = vmatprep.subr.mxu1 %v2822_v1 }
 0xc80   :  { %2552 = vmatpush3.msra.mxu0 %v2947_v15  ;;  %2561 = vmatpush3.msra.mxu1 %v2981_v35 }
 0xc81   :  { %2553 = vmatprep.subr.mxu0 %v2822_v1  ;;  %2562 = vmatprep.subr.mxu1 %v2822_v1 }
 0xc82   :  { %2554 = vmatpush3.msra.mxu0 %v2951_v16  ;;  %2563 = vmatpush3.msra.mxu1 %v2990_v38 }
 0xc83   :  { %2569 = vmatprep.subr.mxu0 %v2822_v1  ;;  %2564 = vmatprep.subr.mxu1 %v2822_v1 }
 0xc84   :  { %2565 = vmatpush3.msra.mxu1 %v2997_v39  ;;  %2566 = vmatprep.mubr.msk.f32.mxu1 %vm2823_vm0, %v2822_v1 }
 0xc85   :  { %2580 = vmatprep.subr.mxu1 %v2822_v1 }
 0xced   :  { %v1265_v23 = vpop.permute.xlu0 %1264 }
 0xd3b   :  { %v3143_v4 = vpop.f32.mrf.mxu0 }
 0xd3c   :  { %v1253_v6 = vpop.f32.mrf.mxu1 }
 0xd3d   :  { %v1257_v11 = vadd.f32 %v1253_v6, %v1186_v5  ;;  %v2535_v17 = vpop.f32.mrf.mxu0 }
 0xd3e   :  { %v2546_v18 = vpop.f32.mrf.mxu1 }
 0xd3f   :  { %v2258_v19 = vmul.f32 -1.442695, %v1257_v11 }
 0xd41   :  { %2706 = vpow2.f32 %v2258_v19 }
 0xd4e   :  { %v2707_v20 = vpop.eup %2706 }
 0xd4f   :  { %v1261_v21 = vadd.f32 1.0, %v2707_v20 }
 0xd51   :  { %2708 = vrcp.f32 %v1261_v21 }
 0xd5e   :  { %v2709_v22 = vpop.eup %2708 }
 0xd5f   :  { %v1267_v24 = vmul.f32 %v2709_v22, %v1265_v23  ;;  %v1350_v31 = vsub.f32 1.0, %v2709_v22  ;;  %v1349_v33 = vmul.f32 %v2709_v22, %v1102_v3 }
 0xd61   :  { %1269 = vrot.lane.b32.xlu1 %v1267_v24, %s2825_s11 }
 0xdd3   :  { %v1270_v25 = vpop.permute.xlu1 %1269 }
 0xdd4   :  { %2556 = vmatmul.mubr.msk.f32.vlgmr.msra.gmra.mxu0 %vm163_vm2, %v1270_v25 }
 0xdd5   :  { %2570 = vmatpush3.msra.mxu0 %v2902_v7  ;;  %2577 = vmatprep.mubr.msk.f32.mxu0 %vm2823_vm0, %v2822_v1 }
 0xdd6   :  { %2571 = vmatprep.subr.mxu0 %v2822_v1 }
 0xdd7   :  { %2572 = vmatpush3.msra.mxu0 %v2908_v8 }
 0xdd8   :  { %2573 = vmatprep.subr.mxu0 %v2822_v1 }
 0xdd9   :  { %2574 = vmatpush3.msra.mxu0 %v2914_v9 }
 0xdda   :  { %2575 = vmatprep.subr.mxu0 %v2822_v1 }
 0xddb   :  { %2576 = vmatpush3.msra.mxu0 %v2928_v12 }
 0xddc   :  { %2591 = vmatprep.subr.mxu0 %v2822_v1 }
 0xe94   :  { %v1339_v26 = vpop.f32.mrf.mxu0 }
 0xe95   :  { %1344 = vrot.lane.b32.xlu0 %v1339_v26, %s2826_s3 }
 0xe96   :  { %v2557_v27 = vpop.f32.mrf.mxu0 }
 0xf07   :  { %v1345_v28 = vpop.permute.xlu0 %1344 }
 0xf08   :  { %v1347_v29 = vadd.f32 %v1345_v28, %v1186_v5  ;;  %v1694_v5 = vld [vmem:[#allocation2 + $0x6] sm:$0x1] }
 0xf0a   :  { %2710 = vtanh.f32 %v1347_v29 }
 0xf17   :  { %v2711_v30 = vpop.eup %2710 }
 0xf18   :  { %1352 = vrot.lane.b32.xlu1 %v2711_v30, %s2826_s3 }
 0xf8a   :  { %v1353_v32 = vpop.permute.xlu1 %1352 }
 0xf8b   :  { %v1355_v36 = vmul.f32 %v1353_v32, %v1350_v31 }
 0xf8d   :  { %v1356_v37 = vadd.f32 %v1355_v36, %v1349_v33 }
 0xf8f   :  { %1518 = vrot.lane.b32.xlu0 %v1356_v37, %s2824_s1  ;;  %2567 = vmatmul.mubr.msk.f32.vlgmr.msra.gmra.mxu1 %vm163_vm2, %v1356_v37 }
 0xf90   :  { %2578 = vmatmul.mubr.msk.f32.vlgmr.msra.gmra.mxu0 %vm163_vm2, %v1356_v37  ;;  %2581 = vmatpush3.msra.mxu1 %v2941_v13 }
 0xf91   :  { %2582 = vmatprep.subr.mxu1 %v2822_v1  ;;  %2588 = vmatprep.mubr.msk.f32.mxu1 %vm2823_vm0, %v2822_v1 }
 0xf92   :  { %2583 = vmatpush3.msra.mxu1 %v2943_v14  ;;  %2592 = vmatpush3.msra.mxu0 %v2976_v34 }
 0xf93   :  { %2584 = vmatprep.subr.mxu1 %v2822_v1  ;;  %2593 = vmatprep.subr.mxu0 %v2822_v1 }
 0xf94   :  { %2585 = vmatpush3.msra.mxu1 %v2947_v15  ;;  %2594 = vmatpush3.msra.mxu0 %v2981_v35 }
 0xf95   :  { %2586 = vmatprep.subr.mxu1 %v2822_v1  ;;  %2595 = vmatprep.subr.mxu0 %v2822_v1 }
 0xf96   :  { %2587 = vmatpush3.msra.mxu1 %v2951_v16  ;;  %2596 = vmatpush3.msra.mxu0 %v2990_v38 }
 0xf97   :  { %2602 = vmatprep.subr.mxu1 %v2822_v1  ;;  %2597 = vmatprep.subr.mxu0 %v2822_v1 }
 0xf98   :  { %2598 = vmatpush3.msra.mxu0 %v2997_v39  ;;  %2599 = vmatprep.mubr.msk.f32.mxu0 %vm2823_vm0, %v2822_v1 }
 0xf99   :  { %2613 = vmatprep.subr.mxu0 %v2822_v1 }
0x1001   :  { %v1519_v52 = vpop.permute.xlu0 %1518 }
0x104f   :  { %v3182_v40 = vpop.f32.mrf.mxu1 }
0x1050   :  { %v1507_v43 = vpop.f32.mrf.mxu0 }
0x1051   :  { %v1511_v44 = vadd.f32 %v1507_v43, %v1440_v41  ;;  %v2568_v45 = vpop.f32.mrf.mxu1 }
0x1052   :  { %v2579_v47 = vpop.f32.mrf.mxu0 }
0x1053   :  { %v2263_v48 = vmul.f32 -1.442695, %v1511_v44  ;;  %v158_v44 = vld [vmem:[#allocation3] sm:$0x1] }
0x1055   :  { %2712 = vpow2.f32 %v2263_v48  ;;  %v411_v48 = vadd.f32 %v3026_v46, %v158_v44  ;;  %v1427_v46 = vadd.f32 %v3182_v40, %v158_v44 }
0x1062   :  { %v2713_v49 = vpop.eup %2712 }
0x1063   :  { %v1515_v50 = vadd.f32 1.0, %v2713_v49  ;;  %v1173_v49 = vadd.f32 %v3143_v4, %v158_v44 }
0x1065   :  { %2714 = vrcp.f32 %v1515_v50 }
0x1072   :  { %v2715_v51 = vpop.eup %2714 }
0x1073   :  { %v1521_v53 = vmul.f32 %v2715_v51, %v1519_v52  ;;  %v1604_v60 = vsub.f32 1.0, %v2715_v51  ;;  %v1603_v62 = vmul.f32 %v2715_v51, %v1356_v37 }
0x1075   :  { %1523 = vrot.lane.b32.xlu1 %v1521_v53, %s2825_s11 }
0x10e7   :  { %v1524_v54 = vpop.permute.xlu1 %1523 }
0x10e8   :  { %2589 = vmatmul.mubr.msk.f32.vlgmr.msra.gmra.mxu1 %vm163_vm2, %v1524_v54  ;;  %v665_v54 = vadd.f32 %v3065_v10, %v158_v44 }
0x10e9   :  { %2603 = vmatpush3.msra.mxu1 %v2902_v7  ;;  %2610 = vmatprep.mubr.msk.f32.mxu1 %vm2823_vm0, %v2822_v1 }
0x10ea   :  { %2604 = vmatprep.subr.mxu1 %v2822_v1 }
0x10eb   :  { %2605 = vmatpush3.msra.mxu1 %v2908_v8 }
0x10ec   :  { %2606 = vmatprep.subr.mxu1 %v2822_v1 }
0x10ed   :  { %2607 = vmatpush3.msra.mxu1 %v2914_v9 }
0x10ee   :  { %2608 = vmatprep.subr.mxu1 %v2822_v1 }
0x10ef   :  { %2609 = vmatpush3.msra.mxu1 %v2928_v12 }
0x10f0   :  { %2624 = vmatprep.subr.mxu1 %v2822_v1 }
0x11a8   :  { %v1593_v55 = vpop.f32.mrf.mxu1 }
0x11a9   :  { %1598 = vrot.lane.b32.xlu0 %v1593_v55, %s2826_s3  ;;  %v919_v55 = vadd.f32 %v3104_v42, %v158_v44 }
0x11aa   :  { %v2590_v56 = vpop.f32.mrf.mxu1 }
0x121b   :  { %v1599_v57 = vpop.permute.xlu0 %1598 }
0x121c   :  { %v1601_v58 = vadd.f32 %v1599_v57, %v1440_v41 }
0x121e   :  { %2716 = vtanh.f32 %v1601_v58 }
0x122b   :  { %v2717_v59 = vpop.eup %2716 }
0x122c   :  { %1606 = vrot.lane.b32.xlu1 %v2717_v59, %s2826_s3 }
0x129e   :  { %v1607_v61 = vpop.permute.xlu1 %1606 }
0x129f   :  { %v1609_v63 = vmul.f32 %v1607_v61, %v1604_v60 }
0x12a1   :  { %v1610_v0 = vadd.f32 %v1609_v63, %v1603_v62 }
0x12a3   :  { %1772 = vrot.lane.b32.xlu0 %v1610_v0, %s2824_s1  ;;  %2600 = vmatmul.mubr.msk.f32.vlgmr.msra.gmra.mxu0 %vm163_vm2, %v1610_v0 }
0x12a4   :  { %2611 = vmatmul.mubr.msk.f32.vlgmr.msra.gmra.mxu1 %vm163_vm2, %v1610_v0  ;;  %2614 = vmatpush3.msra.mxu0 %v2941_v13 }
0x12a5   :  { %2615 = vmatprep.subr.mxu0 %v2822_v1  ;;  %2621 = vmatprep.mubr.msk.f32.mxu0 %vm2823_vm0, %v2822_v1 }
0x12a6   :  { %2616 = vmatpush3.msra.mxu0 %v2943_v14  ;;  %2625 = vmatpush3.msra.mxu1 %v2976_v34 }
0x12a7   :  { %2617 = vmatprep.subr.mxu0 %v2822_v1  ;;  %2626 = vmatprep.subr.mxu1 %v2822_v1 }
0x12a8   :  { %2618 = vmatpush3.msra.mxu0 %v2947_v15  ;;  %2627 = vmatpush3.msra.mxu1 %v2981_v35 }
0x12a9   :  { %2619 = vmatprep.subr.mxu0 %v2822_v1  ;;  %2628 = vmatprep.subr.mxu1 %v2822_v1 }
0x12aa   :  { %2620 = vmatpush3.msra.mxu0 %v2951_v16  ;;  %2629 = vmatpush3.msra.mxu1 %v2990_v38 }
0x12ab   :  { %2635 = vmatprep.subr.mxu0 %v2822_v1  ;;  %2630 = vmatprep.subr.mxu1 %v2822_v1 }
0x12ac   :  { %2631 = vmatpush3.msra.mxu1 %v2997_v39  ;;  %2632 = vmatprep.mubr.msk.f32.mxu1 %vm2823_vm0, %v2822_v1 }
0x12ad   :  { %2646 = vmatprep.subr.mxu1 %v2822_v1 }
0x1315   :  { %v1773_v23 = vpop.permute.xlu0 %1772 }
0x1363   :  { %v3221_v3 = vpop.f32.mrf.mxu0 }
0x1364   :  { %v1761_v6 = vpop.f32.mrf.mxu1  ;;  %v1681_v50 = vadd.f32 %v3221_v3, %v158_v44 }
0x1365   :  { %v1765_v11 = vadd.f32 %v1761_v6, %v1694_v5  ;;  %v2601_v17 = vpop.f32.mrf.mxu0 }
0x1366   :  { %v2612_v18 = vpop.f32.mrf.mxu1 }
0x1367   :  { %v2268_v19 = vmul.f32 -1.442695, %v1765_v11 }
0x1369   :  { %2718 = vpow2.f32 %v2268_v19 }
0x1376   :  { %v2719_v20 = vpop.eup %2718 }
0x1377   :  { %v1769_v21 = vadd.f32 1.0, %v2719_v20 }
0x1379   :  { %2720 = vrcp.f32 %v1769_v21 }
0x1386   :  { %v2721_v22 = vpop.eup %2720 }
0x1387   :  { %v1775_v24 = vmul.f32 %v2721_v22, %v1773_v23  ;;  %v1857_v31 = vmul.f32 %v2721_v22, %v1610_v0 }
0x1389   :  { %1777 = vrot.lane.b32.xlu1 %v1775_v24, %s2825_s11 }
0x13fb   :  { %v1778_v25 = vpop.permute.xlu1 %1777 }
0x13fc   :  { %2622 = vmatmul.mubr.msk.f32.vlgmr.msra.gmra.mxu0 %vm163_vm2, %v1778_v25 }
0x13fd   :  { %2636 = vmatpush3.msra.mxu0 %v2902_v7  ;;  %2643 = vmatprep.mubr.msk.f32.mxu0 %vm2823_vm0, %v2822_v1 }
0x13fe   :  { %2637 = vmatprep.subr.mxu0 %v2822_v1 }
0x13ff   :  { %2638 = vmatpush3.msra.mxu0 %v2908_v8  ;;  %v1858_v8 = vsub.f32 1.0, %v2721_v22 }
0x1400   :  { %2639 = vmatprep.subr.mxu0 %v2822_v1 }
0x1401   :  { %2640 = vmatpush3.msra.mxu0 %v2914_v9 }
0x1402   :  { %2641 = vmatprep.subr.mxu0 %v2822_v1 }
0x1403   :  { %2642 = vmatpush3.msra.mxu0 %v2928_v12 }
0x1404   :  { %2657 = vmatprep.subr.mxu0 %v2822_v1 }
0x14bc   :  { %v1847_v26 = vpop.f32.mrf.mxu0 }
0x14bd   :  { %1852 = vrot.lane.b32.xlu0 %v1847_v26, %s2826_s3 }
0x14be   :  { %v2623_v7 = vpop.f32.mrf.mxu0 }
0x152f   :  { %v1853_v27 = vpop.permute.xlu0 %1852 }
0x1530   :  { %v1855_v28 = vadd.f32 %v1853_v27, %v1694_v5 }
0x1532   :  { %2722 = vtanh.f32 %v1855_v28 }
0x153f   :  { %v2723_v29 = vpop.eup %2722 }
0x1540   :  { %1860 = vrot.lane.b32.xlu1 %v2723_v29, %s2826_s3 }
0x15b2   :  { %v1861_v30 = vpop.permute.xlu1 %1860 }
0x15b3   :  { %v1863_v9 = vmul.f32 %v1861_v30, %v1858_v8 }
0x15b5   :  { %v3237_v32 = vadd.f32 %v1863_v9, %v1857_v31 }
0x15b7   :  { %2026 = vrot.lane.b32.xlu0 %v3237_v32, %s2824_s1  ;;  %2633 = vmatmul.mubr.msk.f32.vlgmr.msra.gmra.mxu1 %vm163_vm2, %v3237_v32 }
0x15b8   :  { %2644 = vmatmul.mubr.msk.f32.vlgmr.msra.gmra.mxu0 %vm163_vm2, %v3237_v32  ;;  %2647 = vmatpush3.msra.mxu1 %v2941_v13  ;;  %v1948_v13 = vld [vmem:[#allocation2 + $0x7] sm:$0x1] }
0x15b9   :  { %2648 = vmatprep.subr.mxu1 %v2822_v1  ;;  %2654 = vmatprep.mubr.msk.f32.mxu1 %vm2823_vm0, %v2822_v1 }
0x15ba   :  { %2649 = vmatpush3.msra.mxu1 %v2943_v14  ;;  %2658 = vmatpush3.msra.mxu0 %v2976_v34 }
0x15bb   :  { %2650 = vmatprep.subr.mxu1 %v2822_v1  ;;  %2659 = vmatprep.subr.mxu0 %v2822_v1 }
0x15bc   :  { %2651 = vmatpush3.msra.mxu1 %v2947_v15  ;;  %2660 = vmatpush3.msra.mxu0 %v2981_v35 }
0x15bd   :  { %2652 = vmatprep.subr.mxu1 %v2822_v1  ;;  %2661 = vmatprep.subr.mxu0 %v2822_v1 }
0x15be   :  { %2653 = vmatpush3.msra.mxu1 %v2951_v16  ;;  %2662 = vmatpush3.msra.mxu0 %v2990_v38 }
0x15bf   :  { %2663 = vmatprep.subr.mxu0 %v2822_v1  ;;  %2665 = vmatprep.mubr.msk.f32.mxu0 %vm2823_vm0, %v2822_v1 }
0x15c0   :  { %2664 = vmatpush3.msra.mxu0 %v2997_v39  ;;  %v2827_v39 = vmov 0  }
0x15c1   :  { %2680 = vset.pattern.permute.xlu0 %v2827_v39  ;;  %2681 = vset.pattern.permute.xlu1 %v2827_v39 }
0x1629   :  { %v2027_v38 = vpop.permute.xlu0 %2026 }
0x1677   :  { %v1934_v12 = vpop.f32.mrf.mxu1 }
0x1678   :  { %v2015_v14 = vpop.f32.mrf.mxu0  ;;  %v1935_v4 = vadd.f32 %v1934_v12, %v158_v44 }
0x1679   :  { %v2019_v15 = vadd.f32 %v2015_v14, %v1948_v13  ;;  %v2634_v34 = vpop.f32.mrf.mxu1 }
0x167a   :  { %v2645_v35 = vpop.f32.mrf.mxu0 }
0x167b   :  { %v2273_v33 = vmul.f32 -1.442695, %v2019_v15 }
0x167d   :  { %2724 = vpow2.f32 %v2273_v33 }
0x168a   :  { %v2725_v36 = vpop.eup %2724 }
0x168b   :  { %v2023_v37 = vadd.f32 1.0, %v2725_v36 }
0x168d   :  { %2726 = vrcp.f32 %v2023_v37 }
0x169a   :  { %v2727_v16 = vpop.eup %2726 }
0x169b   :  { %v2029_v41 = vmul.f32 %v2727_v16, %v2027_v38  ;;  %v2112_v56 = vsub.f32 1.0, %v2727_v16  ;;  %v2111_v58 = vmul.f32 %v2727_v16, %v3237_v32 }
0x169d   :  { %2031 = vrot.lane.b32.xlu1 %v2029_v41, %s2825_s11 }
0x170f   :  { %v2032_v43 = vpop.permute.xlu1 %2031 }
0x1710   :  { %2655 = vmatmul.mubr.msk.f32.vlgmr.msra.gmra.mxu1 %vm163_vm2, %v2032_v43 }
0x17d0   :  { %v2101_v45 = vpop.f32.mrf.mxu1 }
0x17d1   :  { %2106 = vrot.lane.b32.xlu0 %v2101_v45, %s2826_s3 }
0x17d2   :  { %v2656_v47 = vpop.f32.mrf.mxu1 }
0x17d5   :  { %419 = vperm.xlu0 %2680, %v411_v48  }
0x17d9   :  { %1181 = vperm.xlu0 %2680, %v1173_v49  }
0x17dd   :  { %1689 = vperm.xlu0 %2680, %v1681_v50  }
0x1843   :  { %v2107_v51 = vpop.permute.xlu0 %2106 }
0x1844   :  { %v2109_v52 = vadd.f32 %v2107_v51, %v1948_v13 }
0x1846   :  { %2728 = vtanh.f32 %v2109_v52 }
0x1853   :  { %v2729_v53 = vpop.eup %2728 }
0x1854   :  { %2114 = vrot.lane.b32.xlu1 %v2729_v53, %s2826_s3 }
0x1858   :  { %673 = vperm.xlu1 %2681, %v665_v54  }
0x185c   :  { %927 = vperm.xlu1 %2681, %v919_v55  }
0x1860   :  { %1435 = vperm.xlu1 %2681, %v1427_v46  }
0x1864   :  { %1943 = vperm.xlu1 %2681, %v1935_v4  }
0x18c6   :  { %v2115_v57 = vpop.permute.xlu1 %2114 }
0x18c7   :  { %v2117_v59 = vmul.f32 %v2115_v57, %v2112_v56 }
0x18c9   :  { %v2118_v60 = vadd.f32 %v2117_v59, %v2111_v58 }
0x18cb   :  { %2666 = vmatmul.mubr.msk.f32.vlgmr.msra.gmra.mxu0 %vm163_vm2, %v2118_v60  ;;  %2204 = vst.msk [vmem:[#allocation10] sm:$0x1] %vm2203_vm4, %v2118_v60 }
0x198b   :  { %v2188_v10 = vpop.f32.mrf.mxu0 }
0x198c   :  { %v2189_v61 = vadd.f32 %v2188_v10, %v158_v44 }
0x198d   :  { %v2667_v62 = vpop.f32.mrf.mxu0 }
0x198e   :  { %2197 = vperm.xlu0 %2680, %v2189_v61  }
0x198f   :  { %2781 = shalt.err (!%p2778_p0)
}
0x1990   :  { %2224 = dma.vmem_to_hbm [thread:$0]  %s2222_s19, 16, %s3299_s9, [#allocation11]   ;;  %v160_v42 = vand.u32 127, %v159_v2  ;;  %v674_v40 = vpop.permute.xlu1 %673  ;;  %v420_v3 = vpop.permute.xlu0 %419 }
0x1991   :  { %s2829_s9 = smov [#allocation9]  }
0x1992   :  { %vm668_vm5 = vcmp.eq.s32.totalorder %v160_v42, 1  ;;  %vm414_vm6 = vcmp.eq.s32.totalorder %v160_v42, 0  ;;  %vm922_vm7 = vcmp.eq.s32.totalorder %v160_v42, 2  ;;  %vm1176_vm8 = vcmp.eq.s32.totalorder %v160_v42, 3  ;;  %s2211_s22 = sshll.u32 %s2829_s9, 4  ;;  %s2212_s22 = int_to_ptr.vmem [resolvable:$true] %s2211_s22 }
0x1993   :  { %v2246_v63 = vsel %vm668_vm5, 1.0, %v2822_v1  ;;  %v2241_v0 = vsel %vm414_vm6, 1.0, %v2822_v1  ;;  %v2251_v5 = vsel %vm922_vm7, 1.0, %v2822_v1  ;;  %vm1430_vm9 = vcmp.eq.s32.totalorder %v160_v42, 4  ;;  %s2790_s23 = scalar_lea.vmem %s2212_s22, 16  ;;  %s2794_s24 = scalar_lea.vmem %s2212_s22, 32 }
0x1994   :  { %v928_v6 = vpop.permute.xlu1 %927  ;;  %v676_v11 = vmul.f32 %v2246_v63, %v674_v40  ;;  %v422_v17 = vmul.f32 %v2241_v0, %v420_v3  ;;  %v2256_v2 = vsel %vm1176_vm8, 1.0, %v2822_v1  ;;  %v1182_v20 = vpop.permute.xlu0 %1181  ;;  %v2261_v22 = vsel %vm1430_vm9, 1.0, %v2822_v1  ;;  %p2791_p1 = scmp.ne.s32.totalorder %s2212_s22, %s2790_s23  ;;  %p2795_p2 = scmp.lt.s32.totalorder %s2212_s22, %s2212_s22 }
0x1995   :  { %v930_v18 = vmul.f32 %v2251_v5, %v928_v6  ;;  %v1184_v24 = vmul.f32 %v2256_v2, %v1182_v20  ;;  %vm1684_vm10 = vcmp.eq.s32.totalorder %v160_v42, 5  ;;  %vm1938_vm11 = vcmp.eq.s32.totalorder %v160_v42, 6  ;;  %p2796_p3 = scmp.lt.s32.totalorder %s2794_s24, %s2790_s23 }
0x1996   :  { %v677_v19 = vadd.f32 %v676_v11, %v422_v17  ;;  %v2266_v7 = vsel %vm1684_vm10, 1.0, %v2822_v1  ;;  %v2271_v29 = vsel %vm1938_vm11, 1.0, %v2822_v1  ;;  %vm2192_vm12 = vcmp.eq.s32.totalorder %v160_v42, 7 }
0x1997   :  { %v2276_v32 = vsel %vm2192_vm12, 1.0, %v2822_v1  ;;  %p2797_p4 = por %p2796_p3, %p2795_p2 }
0x1998   :  { %v931_v21 = vadd.f32 %v930_v18, %v677_v19  ;;  %v1436_v23 = vpop.permute.xlu1 %1435  ;;  %v1690_v27 = vpop.permute.xlu0 %1689 }
0x1999   :  { %v1438_v26 = vmul.f32 %v2261_v22, %v1436_v23  ;;  %v1692_v30 = vmul.f32 %v2266_v7, %v1690_v27  ;;  %p2798_p5 = pnand %p2797_p4, %p2791_p1 }
0x199a   :  { %v1185_v25 = vadd.f32 %v1184_v24, %v931_v21 }
0x199c   :  { %v1439_v28 = vadd.f32 %v1438_v26, %v1185_v25  ;;  %v1944_v8 = vpop.permute.xlu1 %1943 }
0x199d   :  { %v1946_v9 = vmul.f32 %v2271_v29, %v1944_v8 }
0x199e   :  { %v1693_v31 = vadd.f32 %v1692_v30, %v1439_v28 }
0x19a0   :  { %v1947_v13 = vadd.f32 %v1946_v9, %v1693_v31 }
0x1a09   :  { %v2198_v12 = vpop.permute.xlu0 %2197 }
0x1a0a   :  { %v2200_v14 = vmul.f32 %v2276_v32, %v2198_v12 }
0x1a0c   :  { %v2201_v15 = vadd.f32 %v2200_v14, %v1947_v13 }
0x1a0e   :  { %2202 = vst [vmem:[#allocation9] sm:$0x1] %v2201_v15 }
0x1a0f   :  { %2801 = shalt.err (!%p2798_p5)
}
0x1a10   :  { %2214 = dma.vmem_to_hbm [thread:$0]  %s2212_s22, 16, %s3298_s8, [#allocation6]  }
0x1a11   :  { %2814 = dma.done.wait [#allocation6], 16  }
0x1a12   :  { %2815 = vsyncadd [#allocation6], 4294967280 }
0x1a13   :  { %2816 = dma.done.wait [#allocation11], 16  }
0x1a14   :  { %2817 = vsyncadd [#allocation11], 4294967280 }
0x1a15   :  { %2231 = vsyncpa [#allocation5], 1 }
0x1a16   :  { %2232 = vsyncpa [#allocation8], 1 }
0x1a17   :  { %2233 = vsyncpa [#allocation6], 1 }
0x1a18   :  { %2234 = vsyncpa [#allocation11], 1 }

</bundles_post_ra>
